<compile_context>
chip_gen: v5e
topology: v5e:2x2
jax: 0.10.0
libtpu: 0.0.40
codegen_flags: <defaults>
</compile_context>

<pallas_src>
import functools
import math

import jax
import jax.numpy as jnp
from jax.experimental import pallas as pl
from jax.experimental.pallas import tpu as pltpu


# --------------------------------------------------------------------------
# helpers
# --------------------------------------------------------------------------
def _layernorm(h, g, b, eps):
    mu = jnp.mean(h, axis=-1, keepdims=True)
    d = h - mu
    var = jnp.mean(d * d, axis=-1, keepdims=True)
    return d * jax.lax.rsqrt(var + eps) * g + b


def positional_encoding(max_len, d_model):
    position = jnp.arange(max_len, dtype=jnp.float32)[:, None]
    div_term = jnp.exp(jnp.arange(0, d_model, 2, dtype=jnp.float32)
                       * (-math.log(10000.0) / d_model))
    pe = jnp.zeros((max_len, d_model), jnp.float32)
    pe = pe.at[:, 0::2].set(jnp.sin(position * div_term))
    pe = pe.at[:, 1::2].set(jnp.cos(position * div_term))
    return pe


# --------------------------------------------------------------------------
# Fused whole-model kernel: one grid step == one batch row
# --------------------------------------------------------------------------
def _model_kernel(ids_ref, tab_ref, pe_ref,
                  w_qkv_ref, b_qkv_ref, w_out_ref, b_out_ref,
                  ln1_g_ref, ln1_b_ref,
                  w_ff1_ref, b_ff1_ref, w_ff2_ref, b_ff2_ref,
                  ln2_g_ref, ln2_b_ref,
                  w_proj_ref, b_proj_ref,
                  o_ref,
                  *, num_layers, nhead, last_only, eps=1e-5):
    S, Dm = pe_ref.shape
    V = tab_ref.shape[0]
    Dh = Dm // nhead
    scale = 1.0 / math.sqrt(Dh)
    neg = jnp.float32(-1e30)                      # finite causal-mask value

    # ---- token embedding (one-hot MXU gather) fused with positional enc ----
    ids = ids_ref[0]                              # (S, 1) int32
    iota_v = jax.lax.broadcasted_iota(jnp.int32, (S, V), 1)
    onehot = (iota_v == ids).astype(jnp.bfloat16)            # (S, V)
    x = jnp.dot(onehot, tab_ref[...],
                preferred_element_type=jnp.float32)          # (S, Dm) f32
    x = x + pe_ref[...]

    row = jax.lax.broadcasted_iota(jnp.int32, (S, S), 0)
    col = jax.lax.broadcasted_iota(jnp.int32, (S, S), 1)
    causal = col <= row

    for l in range(num_layers):
        # ---- causal multi-head self-attention (post-LN, as in PyTorch) ----
        qkv = jnp.dot(x.astype(jnp.bfloat16), w_qkv_ref[l],
                      preferred_element_type=jnp.float32) + b_qkv_ref[l]
        heads = []
        for h in range(nhead):
            qh = qkv[:, h * Dh:(h + 1) * Dh].astype(jnp.bfloat16)
            kh = qkv[:, Dm + h * Dh:Dm + (h + 1) * Dh].astype(jnp.bfloat16)
            vh = qkv[:, 2 * Dm + h * Dh:2 * Dm + (h + 1) * Dh].astype(jnp.bfloat16)
            s = jax.lax.dot_general(qh, kh, (((1,), (1,)), ((), ())),
                                    preferred_element_type=jnp.float32) * scale
            s = jnp.where(causal, s, neg)
            m = jnp.max(s, axis=-1, keepdims=True)
            p = jnp.exp(s - m)
            denom = jnp.sum(p, axis=-1, keepdims=True)
            p = p * pl.reciprocal(denom, approx=True)        # EUP, not VALU
            heads.append(jnp.dot(p.astype(jnp.bfloat16), vh,
                                 preferred_element_type=jnp.float32))
        attn = jnp.concatenate(heads, axis=-1)               # (S, Dm) f32
        attn = jnp.dot(attn.astype(jnp.bfloat16), w_out_ref[l],
                       preferred_element_type=jnp.float32) + b_out_ref[l]
        x = _layernorm(x + attn, ln1_g_ref[l], ln1_b_ref[l], eps)

        # ---- feed-forward (ReLU) ----
        h1 = jnp.dot(x.astype(jnp.bfloat16), w_ff1_ref[l],
                     preferred_element_type=jnp.float32) + b_ff1_ref[l]
        h1 = jnp.maximum(h1, 0.0)
        h2 = jnp.dot(h1.astype(jnp.bfloat16), w_ff2_ref[l],
                     preferred_element_type=jnp.float32) + b_ff2_ref[l]
        x = _layernorm(x + h2, ln2_g_ref[l], ln2_b_ref[l], eps)

    # ---- output projection (last token only in generation mode) ----
    if last_only:
        x = x[S - 1:S, :]
    logits = jnp.dot(x.astype(jnp.bfloat16), w_proj_ref[...],
                     preferred_element_type=jnp.float32) + b_proj_ref[...]
    o_ref[0] = logits.astype(o_ref.dtype)


# --------------------------------------------------------------------------
# StandardTransformer.forward
# --------------------------------------------------------------------------
def transformer_forward(src, params, *, nhead, generation=False):
    B, S = src.shape
    V, Dm = params["embedding"].shape
    L = params["w_qkv"].shape[0]
    Dff = params["w_ff1"].shape[-1]
    Dh = Dm // nhead
    S_out = 1 if generation else S

    ids = src.astype(jnp.int32).reshape(B, S, 1)

    def full(shape):
        return pl.BlockSpec(shape, lambda b: (0,) * len(shape))

    in_specs = [
        pl.BlockSpec((1, S, 1), lambda b: (b, 0, 0)),        # ids
        full((V, Dm)),                                       # embedding table
        pl.BlockSpec((S, Dm), lambda b: (0, 0)),             # pe[:S]
        full((L, Dm, 3 * Dm)), full((L, 1, 3 * Dm)),         # qkv
        full((L, Dm, Dm)), full((L, 1, Dm)),                 # out proj
        full((L, 1, Dm)), full((L, 1, Dm)),                  # ln1
        full((L, Dm, Dff)), full((L, 1, Dff)),               # ff1
        full((L, Dff, Dm)), full((L, 1, Dm)),                # ff2
        full((L, 1, Dm)), full((L, 1, Dm)),                  # ln2
        full((Dm, V)), full((1, V)),                         # output projection
    ]

    call_args = (ids, params["embedding"], params["pe"],
                 params["w_qkv"], params["b_qkv"],
                 params["w_out"], params["b_out"],
                 params["ln1_g"], params["ln1_b"],
                 params["w_ff1"], params["b_ff1"],
                 params["w_ff2"], params["b_ff2"],
                 params["ln2_g"], params["ln2_b"],
                 params["w_proj"], params["b_proj"])

    flops_layer = (2 * S * Dm * 3 * Dm
                   + nhead * (2 * S * S * Dh) * 2
                   + 2 * S * Dm * Dm
                   + 2 * S * Dm * Dff
                   + 2 * S * Dff * Dm)
    cost = pl.CostEstimate(
        flops=int(B * (2 * S * V * Dm + L * flops_layer + 2 * S_out * Dm * V)),
        transcendentals=int(B * L * nhead * S * S),
        bytes_accessed=int(sum(a.size * a.dtype.itemsize for a in call_args)
                           + B * S_out * V * 4),
    )

    logits = pl.pallas_call(
        functools.partial(_model_kernel, num_layers=L, nhead=nhead,
                          last_only=generation),
        out_shape=jax.ShapeDtypeStruct((B, S_out, V), jnp.float32),
        grid=(B,),
        in_specs=in_specs,
        out_specs=pl.BlockSpec((1, S_out, V), lambda b: (b, 0, 0)),
        compiler_params=pltpu.CompilerParams(
            dimension_semantics=("parallel",)),
        cost_estimate=cost,
    )(*call_args)

    if generation:
        return jnp.argmax(logits, axis=-1)                   # (B, 1)
    return logits                                            # (B, S, V)


# --------------------------------------------------------------------------
# Deterministic parameter init.  Linear weights are stored pre-transposed as
# (in_features, out_features) == W^T; matmul weights pre-cast to bf16 so the
# forward pass never emits wrapper-side casts.
# --------------------------------------------------------------------------
def init_params(key, *, num_layers, d_model, dim_feedforward,
                num_embeddings, max_len):
    def linear(k, fan_in, fan_out):
        kw, kb = jax.random.split(k)
        bound = 1.0 / math.sqrt(fan_in)
        w = jax.random.uniform(kw, (fan_in, fan_out), jnp.float32, -bound, bound)
        b = jax.random.uniform(kb, (fan_out,), jnp.float32, -bound, bound)
        return w, b

    keys = jax.random.split(key, num_layers + 2)
    emb = jax.random.normal(keys[0], (num_embeddings, d_model), jnp.float32)

    names = ["w_qkv", "b_qkv", "w_out", "b_out", "w_ff1", "b_ff1",
             "w_ff2", "b_ff2", "ln1_g", "ln1_b", "ln2_g", "ln2_b"]
    stacks = {n: [] for n in names}
    for l in range(num_layers):
        k1, k2, k3, k4 = jax.random.split(keys[1 + l], 4)
        w_qkv, b_qkv = linear(k1, d_model, 3 * d_model)      # in_proj [Q|K|V]
        w_out, b_out = linear(k2, d_model, d_model)
        w_ff1, b_ff1 = linear(k3, d_model, dim_feedforward)
        w_ff2, b_ff2 = linear(k4, dim_feedforward, d_model)
        stacks["w_qkv"].append(w_qkv);  stacks["b_qkv"].append(b_qkv[None, :])
        stacks["w_out"].append(w_out);  stacks["b_out"].append(b_out[None, :])
        stacks["w_ff1"].append(w_ff1);  stacks["b_ff1"].append(b_ff1[None, :])
        stacks["w_ff2"].append(w_ff2);  stacks["b_ff2"].append(b_ff2[None, :])
        stacks["ln1_g"].append(jnp.ones((1, d_model), jnp.float32))
        stacks["ln1_b"].append(jnp.zeros((1, d_model), jnp.float32))
        stacks["ln2_g"].append(jnp.ones((1, d_model), jnp.float32))
        stacks["ln2_b"].append(jnp.zeros((1, d_model), jnp.float32))

    w_proj, b_proj = linear(keys[-1], d_model, num_embeddings)

    params = {n: jnp.stack(stacks[n]) for n in names}
    for n in ["w_qkv", "w_out", "w_ff1", "w_ff2"]:           # MXU operands
        params[n] = params[n].astype(jnp.bfloat16)
    params["embedding"] = emb.astype(jnp.bfloat16)
    params["w_proj"] = w_proj.astype(jnp.bfloat16)
    params["b_proj"] = b_proj[None, :]
    params["pe"] = positional_encoding(max_len, d_model)
    return params


if __name__ == "__main__":
    # small shapes consistent with the module
    d_model, nhead, num_layers = 128, 4, 2
    dim_feedforward, num_embeddings, max_len = 256, 256, 64
    batch, seq_len = 2, 8

    root = jax.random.PRNGKey(0)
    pk, sk = jax.random.split(root)
    params = init_params(pk, num_layers=num_layers, d_model=d_model,
                         dim_feedforward=dim_feedforward,
                         num_embeddings=num_embeddings, max_len=max_len)
    src = jax.random.randint(sk, (batch, seq_len), 0, num_embeddings, jnp.int32)

    fwd = jax.jit(functools.partial(transformer_forward, nhead=nhead,
                                    generation=False))
    gen = jax.jit(functools.partial(transformer_forward, nhead=nhead,
                                    generation=True))

    logits = fwd(src, params)
    next_tok = gen(src, params)
    jax.block_until_ready((logits, next_tok))

    assert logits.shape == (batch, seq_len, num_embeddings)
    assert next_tok.shape == (batch, 1)
    assert bool(jnp.isfinite(logits).all())
    assert bool((next_tok >= 0).all()) and bool((next_tok < num_embeddings).all())
    print("KERNEL_OK")
</pallas_src>

<mosaic_0001>
module attributes {stable_mosaic.version = 11 : i64} {
  func.func @_model_kernel(%arg0: i32, %arg1: memref<1x8x1xi32, #tpu.memory_space<vmem>>, %arg2: memref<256x128xbf16, #tpu.memory_space<vmem>>, %arg3: memref<8x128xf32, #tpu.memory_space<vmem>>, %arg4: memref<2x128x384xbf16, #tpu.memory_space<vmem>>, %arg5: memref<2x1x384xf32, #tpu.memory_space<vmem>>, %arg6: memref<2x128x128xbf16, #tpu.memory_space<vmem>>, %arg7: memref<2x1x128xf32, #tpu.memory_space<vmem>>, %arg8: memref<2x1x128xf32, #tpu.memory_space<vmem>>, %arg9: memref<2x1x128xf32, #tpu.memory_space<vmem>>, %arg10: memref<2x128x256xbf16, #tpu.memory_space<vmem>>, %arg11: memref<2x1x256xf32, #tpu.memory_space<vmem>>, %arg12: memref<2x256x128xbf16, #tpu.memory_space<vmem>>, %arg13: memref<2x1x128xf32, #tpu.memory_space<vmem>>, %arg14: memref<2x1x128xf32, #tpu.memory_space<vmem>>, %arg15: memref<2x1x128xf32, #tpu.memory_space<vmem>>, %arg16: memref<128x256xbf16, #tpu.memory_space<vmem>>, %arg17: memref<1x256xf32, #tpu.memory_space<vmem>>, %arg18: memref<1x8x256xf32, #tpu.memory_space<vmem>>) attributes {dimension_semantics = [#tpu.dimension_semantics<parallel>], iteration_bounds = array<i64: 2>, scalar_prefetch = 0 : i64, scratch_operands = 0 : i64, tpu.core_type = #tpu.core_type<tc>, window_params = [{transform_indices = @transform_0, window_bounds = array<i64: 1, 8, 1>}, {pipeline_mode = #tpu.pipeline_mode<synchronous>, transform_indices = @transform_1, window_bounds = array<i64: 256, 128>}, {transform_indices = @transform_2, window_bounds = array<i64: 8, 128>}, {pipeline_mode = #tpu.pipeline_mode<synchronous>, transform_indices = @transform_3, window_bounds = array<i64: 2, 128, 384>}, {pipeline_mode = #tpu.pipeline_mode<synchronous>, transform_indices = @transform_4, window_bounds = array<i64: 2, 1, 384>}, {pipeline_mode = #tpu.pipeline_mode<synchronous>, transform_indices = @transform_5, window_bounds = array<i64: 2, 128, 128>}, {pipeline_mode = #tpu.pipeline_mode<synchronous>, transform_indices = @transform_6, window_bounds = array<i64: 2, 1, 128>}, {pipeline_mode = #tpu.pipeline_mode<synchronous>, transform_indices = @transform_7, window_bounds = array<i64: 2, 1, 128>}, {pipeline_mode = #tpu.pipeline_mode<synchronous>, transform_indices = @transform_8, window_bounds = array<i64: 2, 1, 128>}, {pipeline_mode = #tpu.pipeline_mode<synchronous>, transform_indices = @transform_9, window_bounds = array<i64: 2, 128, 256>}, {pipeline_mode = #tpu.pipeline_mode<synchronous>, transform_indices = @transform_10, window_bounds = array<i64: 2, 1, 256>}, {pipeline_mode = #tpu.pipeline_mode<synchronous>, transform_indices = @transform_11, window_bounds = array<i64: 2, 256, 128>}, {pipeline_mode = #tpu.pipeline_mode<synchronous>, transform_indices = @transform_12, window_bounds = array<i64: 2, 1, 128>}, {pipeline_mode = #tpu.pipeline_mode<synchronous>, transform_indices = @transform_13, window_bounds = array<i64: 2, 1, 128>}, {pipeline_mode = #tpu.pipeline_mode<synchronous>, transform_indices = @transform_14, window_bounds = array<i64: 2, 1, 128>}, {pipeline_mode = #tpu.pipeline_mode<synchronous>, transform_indices = @transform_15, window_bounds = array<i64: 128, 256>}, {pipeline_mode = #tpu.pipeline_mode<synchronous>, transform_indices = @transform_16, window_bounds = array<i64: 1, 256>}, {transform_indices = @transform_17, window_bounds = array<i64: 1, 8, 256>}]} {
    %c0 = arith.constant 0 : index
    %c0_0 = arith.constant 0 : index
    %c0_1 = arith.constant 0 : index
    %0 = vector.load %arg1[%c0, %c0_0, %c0_1] : memref<1x8x1xi32, #tpu.memory_space<vmem>>, vector<1x8x1xi32>
    %1 = vector.shape_cast %0 : vector<1x8x1xi32> to vector<8x1xi32>
    %2 = tpu.iota {dimensions = array<i32: 1>} : vector<8x256xi32>
    %3 = vector.broadcast %1 : vector<8x1xi32> to vector<8x256xi32>
    %4 = arith.cmpi eq, %2, %3 : vector<8x256xi32>
    %5 = arith.extui %4 : vector<8x256xi1> to vector<8x256xi32>
    %6 = arith.sitofp %5 : vector<8x256xi32> to vector<8x256xf32>
    %7 = arith.truncf %6 : vector<8x256xf32> to vector<8x256xbf16>
    %c0_2 = arith.constant 0 : index
    %c0_3 = arith.constant 0 : index
    %8 = vector.load %arg2[%c0_2, %c0_3] : memref<256x128xbf16, #tpu.memory_space<vmem>>, vector<256x128xbf16>
    %cst = arith.constant dense<0.000000e+00> : vector<8x128xf32>
    %9 = tpu.matmul %7, %8, %cst {dimension_numbers = #tpu.dot_dimension_numbers<[1], [0], [0], [1], [0, 0, 1, 1], [], []>} : vector<8x256xbf16>, vector<256x128xbf16>, vector<8x128xf32> -> vector<8x128xf32>
    %c0_4 = arith.constant 0 : index
    %c0_5 = arith.constant 0 : index
    %10 = vector.load %arg3[%c0_4, %c0_5] : memref<8x128xf32, #tpu.memory_space<vmem>>, vector<8x128xf32>
    %11 = arith.addf %9, %10 : vector<8x128xf32>
    %12 = tpu.iota {dimensions = array<i32: 0>} : vector<8x8xi32>
    %13 = tpu.iota {dimensions = array<i32: 1>} : vector<8x8xi32>
    %14 = arith.cmpi sle, %13, %12 : vector<8x8xi32>
    %15 = arith.truncf %11 : vector<8x128xf32> to vector<8x128xbf16>
    %c0_6 = arith.constant 0 : index
    %c0_7 = arith.constant 0 : index
    %c0_8 = arith.constant 0 : index
    %16 = vector.load %arg4[%c0_6, %c0_7, %c0_8] : memref<2x128x384xbf16, #tpu.memory_space<vmem>>, vector<1x128x384xbf16>
    %17 = vector.shape_cast %16 : vector<1x128x384xbf16> to vector<128x384xbf16>
    %cst_9 = arith.constant dense<0.000000e+00> : vector<8x384xf32>
    %18 = tpu.matmul %15, %17, %cst_9 {dimension_numbers = #tpu.dot_dimension_numbers<[1], [0], [0], [1], [0, 0, 1, 1], [], []>} : vector<8x128xbf16>, vector<128x384xbf16>, vector<8x384xf32> -> vector<8x384xf32>
    %c0_10 = arith.constant 0 : index
    %c0_11 = arith.constant 0 : index
    %c0_12 = arith.constant 0 : index
    %19 = vector.load %arg5[%c0_10, %c0_11, %c0_12] : memref<2x1x384xf32, #tpu.memory_space<vmem>>, vector<1x1x384xf32>
    %20 = vector.shape_cast %19 : vector<1x1x384xf32> to vector<1x384xf32>
    %21 = vector.broadcast %20 : vector<1x384xf32> to vector<8x384xf32>
    %22 = arith.addf %18, %21 : vector<8x384xf32>
    %23 = vector.extract_strided_slice %22 {offsets = [0, 0], sizes = [8, 32], strides = [1, 1]} : vector<8x384xf32> to vector<8x32xf32>
    %24 = arith.truncf %23 : vector<8x32xf32> to vector<8x32xbf16>
    %25 = vector.extract_strided_slice %22 {offsets = [0, 128], sizes = [8, 32], strides = [1, 1]} : vector<8x384xf32> to vector<8x32xf32>
    %26 = arith.truncf %25 : vector<8x32xf32> to vector<8x32xbf16>
    %27 = vector.extract_strided_slice %22 {offsets = [0, 256], sizes = [8, 32], strides = [1, 1]} : vector<8x384xf32> to vector<8x32xf32>
    %28 = arith.truncf %27 : vector<8x32xf32> to vector<8x32xbf16>
    %cst_13 = arith.constant dense<0.000000e+00> : vector<8x8xf32>
    %29 = tpu.matmul %24, %26, %cst_13 {dimension_numbers = #tpu.dot_dimension_numbers<[1], [1], [0], [0], [0, 0, 1, 0], [], []>} : vector<8x32xbf16>, vector<8x32xbf16>, vector<8x8xf32> -> vector<8x8xf32>
    %cst_14 = arith.constant 0.176776692 : f32
    %30 = vector.broadcast %cst_14 : f32 to vector<8x8xf32>
    %31 = arith.mulf %29, %30 : vector<8x8xf32>
    %cst_15 = arith.constant -1.000000e+30 : f32
    %32 = vector.broadcast %cst_15 : f32 to vector<8x8xf32>
    %33 = arith.select %14, %31, %32 : vector<8x8xi1>, vector<8x8xf32>
    %cst_16 = arith.constant dense<0xFF800000> : vector<8xf32>
    %34 = vector.multi_reduction <maximumf>, %33, %cst_16 [1] : vector<8x8xf32> to vector<8xf32>
    %35 = vector.shape_cast %34 : vector<8xf32> to vector<8x1xf32>
    %36 = vector.broadcast %35 : vector<8x1xf32> to vector<8x8xf32>
    %37 = arith.subf %33, %36 : vector<8x8xf32>
    %38 = math.exp %37 : vector<8x8xf32>
    %cst_17 = arith.constant dense<0.000000e+00> : vector<8xf32>
    %39 = vector.multi_reduction <add>, %38, %cst_17 [1] : vector<8x8xf32> to vector<8xf32>
    %40 = vector.shape_cast %39 : vector<8xf32> to vector<8x1xf32>
    %41 = tpu.reciprocal %40 {approx = true} : vector<8x1xf32> -> vector<8x1xf32>
    %42 = vector.broadcast %41 : vector<8x1xf32> to vector<8x8xf32>
    %43 = arith.mulf %38, %42 : vector<8x8xf32>
    %44 = arith.truncf %43 : vector<8x8xf32> to vector<8x8xbf16>
    %cst_18 = arith.constant dense<0.000000e+00> : vector<8x32xf32>
    %45 = tpu.matmul %44, %28, %cst_18 {dimension_numbers = #tpu.dot_dimension_numbers<[1], [0], [0], [1], [0, 0, 1, 1], [], []>} : vector<8x8xbf16>, vector<8x32xbf16>, vector<8x32xf32> -> vector<8x32xf32>
    %46 = vector.extract_strided_slice %22 {offsets = [0, 32], sizes = [8, 32], strides = [1, 1]} : vector<8x384xf32> to vector<8x32xf32>
    %47 = arith.truncf %46 : vector<8x32xf32> to vector<8x32xbf16>
    %48 = vector.extract_strided_slice %22 {offsets = [0, 160], sizes = [8, 32], strides = [1, 1]} : vector<8x384xf32> to vector<8x32xf32>
    %49 = arith.truncf %48 : vector<8x32xf32> to vector<8x32xbf16>
    %50 = vector.extract_strided_slice %22 {offsets = [0, 288], sizes = [8, 32], strides = [1, 1]} : vector<8x384xf32> to vector<8x32xf32>
    %51 = arith.truncf %50 : vector<8x32xf32> to vector<8x32xbf16>
    %cst_19 = arith.constant dense<0.000000e+00> : vector<8x8xf32>
    %52 = tpu.matmul %47, %49, %cst_19 {dimension_numbers = #tpu.dot_dimension_numbers<[1], [1], [0], [0], [0, 0, 1, 0], [], []>} : vector<8x32xbf16>, vector<8x32xbf16>, vector<8x8xf32> -> vector<8x8xf32>
    %cst_20 = arith.constant 0.176776692 : f32
    %53 = vector.broadcast %cst_20 : f32 to vector<8x8xf32>
    %54 = arith.mulf %52, %53 : vector<8x8xf32>
    %cst_21 = arith.constant -1.000000e+30 : f32
    %55 = vector.broadcast %cst_21 : f32 to vector<8x8xf32>
    %56 = arith.select %14, %54, %55 : vector<8x8xi1>, vector<8x8xf32>
    %cst_22 = arith.constant dense<0xFF800000> : vector<8xf32>
    %57 = vector.multi_reduction <maximumf>, %56, %cst_22 [1] : vector<8x8xf32> to vector<8xf32>
    %58 = vector.shape_cast %57 : vector<8xf32> to vector<8x1xf32>
    %59 = vector.broadcast %58 : vector<8x1xf32> to vector<8x8xf32>
    %60 = arith.subf %56, %59 : vector<8x8xf32>
    %61 = math.exp %60 : vector<8x8xf32>
    %cst_23 = arith.constant dense<0.000000e+00> : vector<8xf32>
    %62 = vector.multi_reduction <add>, %61, %cst_23 [1] : vector<8x8xf32> to vector<8xf32>
    %63 = vector.shape_cast %62 : vector<8xf32> to vector<8x1xf32>
    %64 = tpu.reciprocal %63 {approx = true} : vector<8x1xf32> -> vector<8x1xf32>
    %65 = vector.broadcast %64 : vector<8x1xf32> to vector<8x8xf32>
    %66 = arith.mulf %61, %65 : vector<8x8xf32>
    %67 = arith.truncf %66 : vector<8x8xf32> to vector<8x8xbf16>
    %cst_24 = arith.constant dense<0.000000e+00> : vector<8x32xf32>
    %68 = tpu.matmul %67, %51, %cst_24 {dimension_numbers = #tpu.dot_dimension_numbers<[1], [0], [0], [1], [0, 0, 1, 1], [], []>} : vector<8x8xbf16>, vector<8x32xbf16>, vector<8x32xf32> -> vector<8x32xf32>
    %69 = vector.extract_strided_slice %22 {offsets = [0, 64], sizes = [8, 32], strides = [1, 1]} : vector<8x384xf32> to vector<8x32xf32>
    %70 = arith.truncf %69 : vector<8x32xf32> to vector<8x32xbf16>
    %71 = vector.extract_strided_slice %22 {offsets = [0, 192], sizes = [8, 32], strides = [1, 1]} : vector<8x384xf32> to vector<8x32xf32>
    %72 = arith.truncf %71 : vector<8x32xf32> to vector<8x32xbf16>
    %73 = vector.extract_strided_slice %22 {offsets = [0, 320], sizes = [8, 32], strides = [1, 1]} : vector<8x384xf32> to vector<8x32xf32>
    %74 = arith.truncf %73 : vector<8x32xf32> to vector<8x32xbf16>
    %cst_25 = arith.constant dense<0.000000e+00> : vector<8x8xf32>
    %75 = tpu.matmul %70, %72, %cst_25 {dimension_numbers = #tpu.dot_dimension_numbers<[1], [1], [0], [0], [0, 0, 1, 0], [], []>} : vector<8x32xbf16>, vector<8x32xbf16>, vector<8x8xf32> -> vector<8x8xf32>
    %cst_26 = arith.constant 0.176776692 : f32
    %76 = vector.broadcast %cst_26 : f32 to vector<8x8xf32>
    %77 = arith.mulf %75, %76 : vector<8x8xf32>
    %cst_27 = arith.constant -1.000000e+30 : f32
    %78 = vector.broadcast %cst_27 : f32 to vector<8x8xf32>
    %79 = arith.select %14, %77, %78 : vector<8x8xi1>, vector<8x8xf32>
    %cst_28 = arith.constant dense<0xFF800000> : vector<8xf32>
    %80 = vector.multi_reduction <maximumf>, %79, %cst_28 [1] : vector<8x8xf32> to vector<8xf32>
    %81 = vector.shape_cast %80 : vector<8xf32> to vector<8x1xf32>
    %82 = vector.broadcast %81 : vector<8x1xf32> to vector<8x8xf32>
    %83 = arith.subf %79, %82 : vector<8x8xf32>
    %84 = math.exp %83 : vector<8x8xf32>
    %cst_29 = arith.constant dense<0.000000e+00> : vector<8xf32>
    %85 = vector.multi_reduction <add>, %84, %cst_29 [1] : vector<8x8xf32> to vector<8xf32>
    %86 = vector.shape_cast %85 : vector<8xf32> to vector<8x1xf32>
    %87 = tpu.reciprocal %86 {approx = true} : vector<8x1xf32> -> vector<8x1xf32>
    %88 = vector.broadcast %87 : vector<8x1xf32> to vector<8x8xf32>
    %89 = arith.mulf %84, %88 : vector<8x8xf32>
    %90 = arith.truncf %89 : vector<8x8xf32> to vector<8x8xbf16>
    %cst_30 = arith.constant dense<0.000000e+00> : vector<8x32xf32>
    %91 = tpu.matmul %90, %74, %cst_30 {dimension_numbers = #tpu.dot_dimension_numbers<[1], [0], [0], [1], [0, 0, 1, 1], [], []>} : vector<8x8xbf16>, vector<8x32xbf16>, vector<8x32xf32> -> vector<8x32xf32>
    %92 = vector.extract_strided_slice %22 {offsets = [0, 96], sizes = [8, 32], strides = [1, 1]} : vector<8x384xf32> to vector<8x32xf32>
    %93 = arith.truncf %92 : vector<8x32xf32> to vector<8x32xbf16>
    %94 = vector.extract_strided_slice %22 {offsets = [0, 224], sizes = [8, 32], strides = [1, 1]} : vector<8x384xf32> to vector<8x32xf32>
    %95 = arith.truncf %94 : vector<8x32xf32> to vector<8x32xbf16>
    %96 = vector.extract_strided_slice %22 {offsets = [0, 352], sizes = [8, 32], strides = [1, 1]} : vector<8x384xf32> to vector<8x32xf32>
    %97 = arith.truncf %96 : vector<8x32xf32> to vector<8x32xbf16>
    %cst_31 = arith.constant dense<0.000000e+00> : vector<8x8xf32>
    %98 = tpu.matmul %93, %95, %cst_31 {dimension_numbers = #tpu.dot_dimension_numbers<[1], [1], [0], [0], [0, 0, 1, 0], [], []>} : vector<8x32xbf16>, vector<8x32xbf16>, vector<8x8xf32> -> vector<8x8xf32>
    %cst_32 = arith.constant 0.176776692 : f32
    %99 = vector.broadcast %cst_32 : f32 to vector<8x8xf32>
    %100 = arith.mulf %98, %99 : vector<8x8xf32>
    %cst_33 = arith.constant -1.000000e+30 : f32
    %101 = vector.broadcast %cst_33 : f32 to vector<8x8xf32>
    %102 = arith.select %14, %100, %101 : vector<8x8xi1>, vector<8x8xf32>
    %cst_34 = arith.constant dense<0xFF800000> : vector<8xf32>
    %103 = vector.multi_reduction <maximumf>, %102, %cst_34 [1] : vector<8x8xf32> to vector<8xf32>
    %104 = vector.shape_cast %103 : vector<8xf32> to vector<8x1xf32>
    %105 = vector.broadcast %104 : vector<8x1xf32> to vector<8x8xf32>
    %106 = arith.subf %102, %105 : vector<8x8xf32>
    %107 = math.exp %106 : vector<8x8xf32>
    %cst_35 = arith.constant dense<0.000000e+00> : vector<8xf32>
    %108 = vector.multi_reduction <add>, %107, %cst_35 [1] : vector<8x8xf32> to vector<8xf32>
    %109 = vector.shape_cast %108 : vector<8xf32> to vector<8x1xf32>
    %110 = tpu.reciprocal %109 {approx = true} : vector<8x1xf32> -> vector<8x1xf32>
    %111 = vector.broadcast %110 : vector<8x1xf32> to vector<8x8xf32>
    %112 = arith.mulf %107, %111 : vector<8x8xf32>
    %113 = arith.truncf %112 : vector<8x8xf32> to vector<8x8xbf16>
    %cst_36 = arith.constant dense<0.000000e+00> : vector<8x32xf32>
    %114 = tpu.matmul %113, %97, %cst_36 {dimension_numbers = #tpu.dot_dimension_numbers<[1], [0], [0], [1], [0, 0, 1, 1], [], []>} : vector<8x8xbf16>, vector<8x32xbf16>, vector<8x32xf32> -> vector<8x32xf32>
    %115 = tpu.concatenate %45, %68, %91, %114 in 1 : vector<8x32xf32>, vector<8x32xf32>, vector<8x32xf32>, vector<8x32xf32> -> vector<8x128xf32>
    %116 = arith.truncf %115 : vector<8x128xf32> to vector<8x128xbf16>
    %c0_37 = arith.constant 0 : index
    %c0_38 = arith.constant 0 : index
    %c0_39 = arith.constant 0 : index
    %117 = vector.load %arg6[%c0_37, %c0_38, %c0_39] : memref<2x128x128xbf16, #tpu.memory_space<vmem>>, vector<1x128x128xbf16>
    %118 = vector.shape_cast %117 : vector<1x128x128xbf16> to vector<128x128xbf16>
    %cst_40 = arith.constant dense<0.000000e+00> : vector<8x128xf32>
    %119 = tpu.matmul %116, %118, %cst_40 {dimension_numbers = #tpu.dot_dimension_numbers<[1], [0], [0], [1], [0, 0, 1, 1], [], []>} : vector<8x128xbf16>, vector<128x128xbf16>, vector<8x128xf32> -> vector<8x128xf32>
    %c0_41 = arith.constant 0 : index
    %c0_42 = arith.constant 0 : index
    %c0_43 = arith.constant 0 : index
    %120 = vector.load %arg7[%c0_41, %c0_42, %c0_43] : memref<2x1x128xf32, #tpu.memory_space<vmem>>, vector<1x1x128xf32>
    %121 = vector.shape_cast %120 : vector<1x1x128xf32> to vector<1x128xf32>
    %122 = vector.broadcast %121 : vector<1x128xf32> to vector<8x128xf32>
    %123 = arith.addf %119, %122 : vector<8x128xf32>
    %124 = arith.addf %11, %123 : vector<8x128xf32>
    %c0_44 = arith.constant 0 : index
    %c0_45 = arith.constant 0 : index
    %c0_46 = arith.constant 0 : index
    %125 = vector.load %arg8[%c0_44, %c0_45, %c0_46] : memref<2x1x128xf32, #tpu.memory_space<vmem>>, vector<1x1x128xf32>
    %126 = vector.shape_cast %125 : vector<1x1x128xf32> to vector<1x128xf32>
    %c0_47 = arith.constant 0 : index
    %c0_48 = arith.constant 0 : index
    %c0_49 = arith.constant 0 : index
    %127 = vector.load %arg9[%c0_47, %c0_48, %c0_49] : memref<2x1x128xf32, #tpu.memory_space<vmem>>, vector<1x1x128xf32>
    %128 = vector.shape_cast %127 : vector<1x1x128xf32> to vector<1x128xf32>
    %cst_50 = arith.constant dense<0.000000e+00> : vector<8xf32>
    %129 = vector.multi_reduction <add>, %124, %cst_50 [1] : vector<8x128xf32> to vector<8xf32>
    %130 = vector.shape_cast %129 : vector<8xf32> to vector<8x1xf32>
    %cst_51 = arith.constant 1.280000e+02 : f32
    %131 = vector.broadcast %cst_51 : f32 to vector<8x1xf32>
    %132 = arith.divf %130, %131 : vector<8x1xf32>
    %133 = vector.broadcast %132 : vector<8x1xf32> to vector<8x128xf32>
    %134 = arith.subf %124, %133 : vector<8x128xf32>
    %135 = arith.mulf %134, %134 : vector<8x128xf32>
    %cst_52 = arith.constant dense<0.000000e+00> : vector<8xf32>
    %136 = vector.multi_reduction <add>, %135, %cst_52 [1] : vector<8x128xf32> to vector<8xf32>
    %137 = vector.shape_cast %136 : vector<8xf32> to vector<8x1xf32>
    %cst_53 = arith.constant 1.280000e+02 : f32
    %138 = vector.broadcast %cst_53 : f32 to vector<8x1xf32>
    %139 = arith.divf %137, %138 : vector<8x1xf32>
    %cst_54 = arith.constant 9.99999974E-6 : f32
    %140 = vector.broadcast %cst_54 : f32 to vector<8x1xf32>
    %141 = arith.addf %139, %140 : vector<8x1xf32>
    %142 = math.rsqrt %141 : vector<8x1xf32>
    %143 = vector.broadcast %142 : vector<8x1xf32> to vector<8x128xf32>
    %144 = arith.mulf %134, %143 : vector<8x128xf32>
    %145 = vector.broadcast %126 : vector<1x128xf32> to vector<8x128xf32>
    %146 = arith.mulf %144, %145 : vector<8x128xf32>
    %147 = vector.broadcast %128 : vector<1x128xf32> to vector<8x128xf32>
    %148 = arith.addf %146, %147 : vector<8x128xf32>
    %149 = arith.truncf %148 : vector<8x128xf32> to vector<8x128xbf16>
    %c0_55 = arith.constant 0 : index
    %c0_56 = arith.constant 0 : index
    %c0_57 = arith.constant 0 : index
    %150 = vector.load %arg10[%c0_55, %c0_56, %c0_57] : memref<2x128x256xbf16, #tpu.memory_space<vmem>>, vector<1x128x256xbf16>
    %151 = vector.shape_cast %150 : vector<1x128x256xbf16> to vector<128x256xbf16>
    %cst_58 = arith.constant dense<0.000000e+00> : vector<8x256xf32>
    %152 = tpu.matmul %149, %151, %cst_58 {dimension_numbers = #tpu.dot_dimension_numbers<[1], [0], [0], [1], [0, 0, 1, 1], [], []>} : vector<8x128xbf16>, vector<128x256xbf16>, vector<8x256xf32> -> vector<8x256xf32>
    %c0_59 = arith.constant 0 : index
    %c0_60 = arith.constant 0 : index
    %c0_61 = arith.constant 0 : index
    %153 = vector.load %arg11[%c0_59, %c0_60, %c0_61] : memref<2x1x256xf32, #tpu.memory_space<vmem>>, vector<1x1x256xf32>
    %154 = vector.shape_cast %153 : vector<1x1x256xf32> to vector<1x256xf32>
    %155 = vector.broadcast %154 : vector<1x256xf32> to vector<8x256xf32>
    %156 = arith.addf %152, %155 : vector<8x256xf32>
    %cst_62 = arith.constant 0.000000e+00 : f32
    %157 = vector.broadcast %cst_62 : f32 to vector<8x256xf32>
    %158 = arith.maximumf %156, %157 : vector<8x256xf32>
    %159 = arith.truncf %158 : vector<8x256xf32> to vector<8x256xbf16>
    %c0_63 = arith.constant 0 : index
    %c0_64 = arith.constant 0 : index
    %c0_65 = arith.constant 0 : index
    %160 = vector.load %arg12[%c0_63, %c0_64, %c0_65] : memref<2x256x128xbf16, #tpu.memory_space<vmem>>, vector<1x256x128xbf16>
    %161 = vector.shape_cast %160 : vector<1x256x128xbf16> to vector<256x128xbf16>
    %cst_66 = arith.constant dense<0.000000e+00> : vector<8x128xf32>
    %162 = tpu.matmul %159, %161, %cst_66 {dimension_numbers = #tpu.dot_dimension_numbers<[1], [0], [0], [1], [0, 0, 1, 1], [], []>} : vector<8x256xbf16>, vector<256x128xbf16>, vector<8x128xf32> -> vector<8x128xf32>
    %c0_67 = arith.constant 0 : index
    %c0_68 = arith.constant 0 : index
    %c0_69 = arith.constant 0 : index
    %163 = vector.load %arg13[%c0_67, %c0_68, %c0_69] : memref<2x1x128xf32, #tpu.memory_space<vmem>>, vector<1x1x128xf32>
    %164 = vector.shape_cast %163 : vector<1x1x128xf32> to vector<1x128xf32>
    %165 = vector.broadcast %164 : vector<1x128xf32> to vector<8x128xf32>
    %166 = arith.addf %162, %165 : vector<8x128xf32>
    %167 = arith.addf %148, %166 : vector<8x128xf32>
    %c0_70 = arith.constant 0 : index
    %c0_71 = arith.constant 0 : index
    %c0_72 = arith.constant 0 : index
    %168 = vector.load %arg14[%c0_70, %c0_71, %c0_72] : memref<2x1x128xf32, #tpu.memory_space<vmem>>, vector<1x1x128xf32>
    %169 = vector.shape_cast %168 : vector<1x1x128xf32> to vector<1x128xf32>
    %c0_73 = arith.constant 0 : index
    %c0_74 = arith.constant 0 : index
    %c0_75 = arith.constant 0 : index
    %170 = vector.load %arg15[%c0_73, %c0_74, %c0_75] : memref<2x1x128xf32, #tpu.memory_space<vmem>>, vector<1x1x128xf32>
    %171 = vector.shape_cast %170 : vector<1x1x128xf32> to vector<1x128xf32>
    %cst_76 = arith.constant dense<0.000000e+00> : vector<8xf32>
    %172 = vector.multi_reduction <add>, %167, %cst_76 [1] : vector<8x128xf32> to vector<8xf32>
    %173 = vector.shape_cast %172 : vector<8xf32> to vector<8x1xf32>
    %cst_77 = arith.constant 1.280000e+02 : f32
    %174 = vector.broadcast %cst_77 : f32 to vector<8x1xf32>
    %175 = arith.divf %173, %174 : vector<8x1xf32>
    %176 = vector.broadcast %175 : vector<8x1xf32> to vector<8x128xf32>
    %177 = arith.subf %167, %176 : vector<8x128xf32>
    %178 = arith.mulf %177, %177 : vector<8x128xf32>
    %cst_78 = arith.constant dense<0.000000e+00> : vector<8xf32>
    %179 = vector.multi_reduction <add>, %178, %cst_78 [1] : vector<8x128xf32> to vector<8xf32>
    %180 = vector.shape_cast %179 : vector<8xf32> to vector<8x1xf32>
    %cst_79 = arith.constant 1.280000e+02 : f32
    %181 = vector.broadcast %cst_79 : f32 to vector<8x1xf32>
    %182 = arith.divf %180, %181 : vector<8x1xf32>
    %cst_80 = arith.constant 9.99999974E-6 : f32
    %183 = vector.broadcast %cst_80 : f32 to vector<8x1xf32>
    %184 = arith.addf %182, %183 : vector<8x1xf32>
    %185 = math.rsqrt %184 : vector<8x1xf32>
    %186 = vector.broadcast %185 : vector<8x1xf32> to vector<8x128xf32>
    %187 = arith.mulf %177, %186 : vector<8x128xf32>
    %188 = vector.broadcast %169 : vector<1x128xf32> to vector<8x128xf32>
    %189 = arith.mulf %187, %188 : vector<8x128xf32>
    %190 = vector.broadcast %171 : vector<1x128xf32> to vector<8x128xf32>
    %191 = arith.addf %189, %190 : vector<8x128xf32>
    %192 = arith.truncf %191 : vector<8x128xf32> to vector<8x128xbf16>
    %c1 = arith.constant 1 : index
    %c0_81 = arith.constant 0 : index
    %c0_82 = arith.constant 0 : index
    %193 = vector.load %arg4[%c1, %c0_81, %c0_82] : memref<2x128x384xbf16, #tpu.memory_space<vmem>>, vector<1x128x384xbf16>
    %194 = vector.shape_cast %193 : vector<1x128x384xbf16> to vector<128x384xbf16>
    %cst_83 = arith.constant dense<0.000000e+00> : vector<8x384xf32>
    %195 = tpu.matmul %192, %194, %cst_83 {dimension_numbers = #tpu.dot_dimension_numbers<[1], [0], [0], [1], [0, 0, 1, 1], [], []>} : vector<8x128xbf16>, vector<128x384xbf16>, vector<8x384xf32> -> vector<8x384xf32>
    %c1_84 = arith.constant 1 : index
    %c0_85 = arith.constant 0 : index
    %c0_86 = arith.constant 0 : index
    %196 = vector.load %arg5[%c1_84, %c0_85, %c0_86] : memref<2x1x384xf32, #tpu.memory_space<vmem>>, vector<1x1x384xf32>
    %197 = vector.shape_cast %196 : vector<1x1x384xf32> to vector<1x384xf32>
    %198 = vector.broadcast %197 : vector<1x384xf32> to vector<8x384xf32>
    %199 = arith.addf %195, %198 : vector<8x384xf32>
    %200 = vector.extract_strided_slice %199 {offsets = [0, 0], sizes = [8, 32], strides = [1, 1]} : vector<8x384xf32> to vector<8x32xf32>
    %201 = arith.truncf %200 : vector<8x32xf32> to vector<8x32xbf16>
    %202 = vector.extract_strided_slice %199 {offsets = [0, 128], sizes = [8, 32], strides = [1, 1]} : vector<8x384xf32> to vector<8x32xf32>
    %203 = arith.truncf %202 : vector<8x32xf32> to vector<8x32xbf16>
    %204 = vector.extract_strided_slice %199 {offsets = [0, 256], sizes = [8, 32], strides = [1, 1]} : vector<8x384xf32> to vector<8x32xf32>
    %205 = arith.truncf %204 : vector<8x32xf32> to vector<8x32xbf16>
    %cst_87 = arith.constant dense<0.000000e+00> : vector<8x8xf32>
    %206 = tpu.matmul %201, %203, %cst_87 {dimension_numbers = #tpu.dot_dimension_numbers<[1], [1], [0], [0], [0, 0, 1, 0], [], []>} : vector<8x32xbf16>, vector<8x32xbf16>, vector<8x8xf32> -> vector<8x8xf32>
    %cst_88 = arith.constant 0.176776692 : f32
    %207 = vector.broadcast %cst_88 : f32 to vector<8x8xf32>
    %208 = arith.mulf %206, %207 : vector<8x8xf32>
    %cst_89 = arith.constant -1.000000e+30 : f32
    %209 = vector.broadcast %cst_89 : f32 to vector<8x8xf32>
    %210 = arith.select %14, %208, %209 : vector<8x8xi1>, vector<8x8xf32>
    %cst_90 = arith.constant dense<0xFF800000> : vector<8xf32>
    %211 = vector.multi_reduction <maximumf>, %210, %cst_90 [1] : vector<8x8xf32> to vector<8xf32>
    %212 = vector.shape_cast %211 : vector<8xf32> to vector<8x1xf32>
    %213 = vector.broadcast %212 : vector<8x1xf32> to vector<8x8xf32>
    %214 = arith.subf %210, %213 : vector<8x8xf32>
    %215 = math.exp %214 : vector<8x8xf32>
    %cst_91 = arith.constant dense<0.000000e+00> : vector<8xf32>
    %216 = vector.multi_reduction <add>, %215, %cst_91 [1] : vector<8x8xf32> to vector<8xf32>
    %217 = vector.shape_cast %216 : vector<8xf32> to vector<8x1xf32>
    %218 = tpu.reciprocal %217 {approx = true} : vector<8x1xf32> -> vector<8x1xf32>
    %219 = vector.broadcast %218 : vector<8x1xf32> to vector<8x8xf32>
    %220 = arith.mulf %215, %219 : vector<8x8xf32>
    %221 = arith.truncf %220 : vector<8x8xf32> to vector<8x8xbf16>
    %cst_92 = arith.constant dense<0.000000e+00> : vector<8x32xf32>
    %222 = tpu.matmul %221, %205, %cst_92 {dimension_numbers = #tpu.dot_dimension_numbers<[1], [0], [0], [1], [0, 0, 1, 1], [], []>} : vector<8x8xbf16>, vector<8x32xbf16>, vector<8x32xf32> -> vector<8x32xf32>
    %223 = vector.extract_strided_slice %199 {offsets = [0, 32], sizes = [8, 32], strides = [1, 1]} : vector<8x384xf32> to vector<8x32xf32>
    %224 = arith.truncf %223 : vector<8x32xf32> to vector<8x32xbf16>
    %225 = vector.extract_strided_slice %199 {offsets = [0, 160], sizes = [8, 32], strides = [1, 1]} : vector<8x384xf32> to vector<8x32xf32>
    %226 = arith.truncf %225 : vector<8x32xf32> to vector<8x32xbf16>
    %227 = vector.extract_strided_slice %199 {offsets = [0, 288], sizes = [8, 32], strides = [1, 1]} : vector<8x384xf32> to vector<8x32xf32>
    %228 = arith.truncf %227 : vector<8x32xf32> to vector<8x32xbf16>
    %cst_93 = arith.constant dense<0.000000e+00> : vector<8x8xf32>
    %229 = tpu.matmul %224, %226, %cst_93 {dimension_numbers = #tpu.dot_dimension_numbers<[1], [1], [0], [0], [0, 0, 1, 0], [], []>} : vector<8x32xbf16>, vector<8x32xbf16>, vector<8x8xf32> -> vector<8x8xf32>
    %cst_94 = arith.constant 0.176776692 : f32
    %230 = vector.broadcast %cst_94 : f32 to vector<8x8xf32>
    %231 = arith.mulf %229, %230 : vector<8x8xf32>
    %cst_95 = arith.constant -1.000000e+30 : f32
    %232 = vector.broadcast %cst_95 : f32 to vector<8x8xf32>
    %233 = arith.select %14, %231, %232 : vector<8x8xi1>, vector<8x8xf32>
    %cst_96 = arith.constant dense<0xFF800000> : vector<8xf32>
    %234 = vector.multi_reduction <maximumf>, %233, %cst_96 [1] : vector<8x8xf32> to vector<8xf32>
    %235 = vector.shape_cast %234 : vector<8xf32> to vector<8x1xf32>
    %236 = vector.broadcast %235 : vector<8x1xf32> to vector<8x8xf32>
    %237 = arith.subf %233, %236 : vector<8x8xf32>
    %238 = math.exp %237 : vector<8x8xf32>
    %cst_97 = arith.constant dense<0.000000e+00> : vector<8xf32>
    %239 = vector.multi_reduction <add>, %238, %cst_97 [1] : vector<8x8xf32> to vector<8xf32>
    %240 = vector.shape_cast %239 : vector<8xf32> to vector<8x1xf32>
    %241 = tpu.reciprocal %240 {approx = true} : vector<8x1xf32> -> vector<8x1xf32>
    %242 = vector.broadcast %241 : vector<8x1xf32> to vector<8x8xf32>
    %243 = arith.mulf %238, %242 : vector<8x8xf32>
    %244 = arith.truncf %243 : vector<8x8xf32> to vector<8x8xbf16>
    %cst_98 = arith.constant dense<0.000000e+00> : vector<8x32xf32>
    %245 = tpu.matmul %244, %228, %cst_98 {dimension_numbers = #tpu.dot_dimension_numbers<[1], [0], [0], [1], [0, 0, 1, 1], [], []>} : vector<8x8xbf16>, vector<8x32xbf16>, vector<8x32xf32> -> vector<8x32xf32>
    %246 = vector.extract_strided_slice %199 {offsets = [0, 64], sizes = [8, 32], strides = [1, 1]} : vector<8x384xf32> to vector<8x32xf32>
    %247 = arith.truncf %246 : vector<8x32xf32> to vector<8x32xbf16>
    %248 = vector.extract_strided_slice %199 {offsets = [0, 192], sizes = [8, 32], strides = [1, 1]} : vector<8x384xf32> to vector<8x32xf32>
    %249 = arith.truncf %248 : vector<8x32xf32> to vector<8x32xbf16>
    %250 = vector.extract_strided_slice %199 {offsets = [0, 320], sizes = [8, 32], strides = [1, 1]} : vector<8x384xf32> to vector<8x32xf32>
    %251 = arith.truncf %250 : vector<8x32xf32> to vector<8x32xbf16>
    %cst_99 = arith.constant dense<0.000000e+00> : vector<8x8xf32>
    %252 = tpu.matmul %247, %249, %cst_99 {dimension_numbers = #tpu.dot_dimension_numbers<[1], [1], [0], [0], [0, 0, 1, 0], [], []>} : vector<8x32xbf16>, vector<8x32xbf16>, vector<8x8xf32> -> vector<8x8xf32>
    %cst_100 = arith.constant 0.176776692 : f32
    %253 = vector.broadcast %cst_100 : f32 to vector<8x8xf32>
    %254 = arith.mulf %252, %253 : vector<8x8xf32>
    %cst_101 = arith.constant -1.000000e+30 : f32
    %255 = vector.broadcast %cst_101 : f32 to vector<8x8xf32>
    %256 = arith.select %14, %254, %255 : vector<8x8xi1>, vector<8x8xf32>
    %cst_102 = arith.constant dense<0xFF800000> : vector<8xf32>
    %257 = vector.multi_reduction <maximumf>, %256, %cst_102 [1] : vector<8x8xf32> to vector<8xf32>
    %258 = vector.shape_cast %257 : vector<8xf32> to vector<8x1xf32>
    %259 = vector.broadcast %258 : vector<8x1xf32> to vector<8x8xf32>
    %260 = arith.subf %256, %259 : vector<8x8xf32>
    %261 = math.exp %260 : vector<8x8xf32>
    %cst_103 = arith.constant dense<0.000000e+00> : vector<8xf32>
    %262 = vector.multi_reduction <add>, %261, %cst_103 [1] : vector<8x8xf32> to vector<8xf32>
    %263 = vector.shape_cast %262 : vector<8xf32> to vector<8x1xf32>
    %264 = tpu.reciprocal %263 {approx = true} : vector<8x1xf32> -> vector<8x1xf32>
    %265 = vector.broadcast %264 : vector<8x1xf32> to vector<8x8xf32>
    %266 = arith.mulf %261, %265 : vector<8x8xf32>
    %267 = arith.truncf %266 : vector<8x8xf32> to vector<8x8xbf16>
    %cst_104 = arith.constant dense<0.000000e+00> : vector<8x32xf32>
    %268 = tpu.matmul %267, %251, %cst_104 {dimension_numbers = #tpu.dot_dimension_numbers<[1], [0], [0], [1], [0, 0, 1, 1], [], []>} : vector<8x8xbf16>, vector<8x32xbf16>, vector<8x32xf32> -> vector<8x32xf32>
    %269 = vector.extract_strided_slice %199 {offsets = [0, 96], sizes = [8, 32], strides = [1, 1]} : vector<8x384xf32> to vector<8x32xf32>
    %270 = arith.truncf %269 : vector<8x32xf32> to vector<8x32xbf16>
    %271 = vector.extract_strided_slice %199 {offsets = [0, 224], sizes = [8, 32], strides = [1, 1]} : vector<8x384xf32> to vector<8x32xf32>
    %272 = arith.truncf %271 : vector<8x32xf32> to vector<8x32xbf16>
    %273 = vector.extract_strided_slice %199 {offsets = [0, 352], sizes = [8, 32], strides = [1, 1]} : vector<8x384xf32> to vector<8x32xf32>
    %274 = arith.truncf %273 : vector<8x32xf32> to vector<8x32xbf16>
    %cst_105 = arith.constant dense<0.000000e+00> : vector<8x8xf32>
    %275 = tpu.matmul %270, %272, %cst_105 {dimension_numbers = #tpu.dot_dimension_numbers<[1], [1], [0], [0], [0, 0, 1, 0], [], []>} : vector<8x32xbf16>, vector<8x32xbf16>, vector<8x8xf32> -> vector<8x8xf32>
    %cst_106 = arith.constant 0.176776692 : f32
    %276 = vector.broadcast %cst_106 : f32 to vector<8x8xf32>
    %277 = arith.mulf %275, %276 : vector<8x8xf32>
    %cst_107 = arith.constant -1.000000e+30 : f32
    %278 = vector.broadcast %cst_107 : f32 to vector<8x8xf32>
    %279 = arith.select %14, %277, %278 : vector<8x8xi1>, vector<8x8xf32>
    %cst_108 = arith.constant dense<0xFF800000> : vector<8xf32>
    %280 = vector.multi_reduction <maximumf>, %279, %cst_108 [1] : vector<8x8xf32> to vector<8xf32>
    %281 = vector.shape_cast %280 : vector<8xf32> to vector<8x1xf32>
    %282 = vector.broadcast %281 : vector<8x1xf32> to vector<8x8xf32>
    %283 = arith.subf %279, %282 : vector<8x8xf32>
    %284 = math.exp %283 : vector<8x8xf32>
    %cst_109 = arith.constant dense<0.000000e+00> : vector<8xf32>
    %285 = vector.multi_reduction <add>, %284, %cst_109 [1] : vector<8x8xf32> to vector<8xf32>
    %286 = vector.shape_cast %285 : vector<8xf32> to vector<8x1xf32>
    %287 = tpu.reciprocal %286 {approx = true} : vector<8x1xf32> -> vector<8x1xf32>
    %288 = vector.broadcast %287 : vector<8x1xf32> to vector<8x8xf32>
    %289 = arith.mulf %284, %288 : vector<8x8xf32>
    %290 = arith.truncf %289 : vector<8x8xf32> to vector<8x8xbf16>
    %cst_110 = arith.constant dense<0.000000e+00> : vector<8x32xf32>
    %291 = tpu.matmul %290, %274, %cst_110 {dimension_numbers = #tpu.dot_dimension_numbers<[1], [0], [0], [1], [0, 0, 1, 1], [], []>} : vector<8x8xbf16>, vector<8x32xbf16>, vector<8x32xf32> -> vector<8x32xf32>
    %292 = tpu.concatenate %222, %245, %268, %291 in 1 : vector<8x32xf32>, vector<8x32xf32>, vector<8x32xf32>, vector<8x32xf32> -> vector<8x128xf32>
    %293 = arith.truncf %292 : vector<8x128xf32> to vector<8x128xbf16>
    %c1_111 = arith.constant 1 : index
    %c0_112 = arith.constant 0 : index
    %c0_113 = arith.constant 0 : index
    %294 = vector.load %arg6[%c1_111, %c0_112, %c0_113] : memref<2x128x128xbf16, #tpu.memory_space<vmem>>, vector<1x128x128xbf16>
    %295 = vector.shape_cast %294 : vector<1x128x128xbf16> to vector<128x128xbf16>
    %cst_114 = arith.constant dense<0.000000e+00> : vector<8x128xf32>
    %296 = tpu.matmul %293, %295, %cst_114 {dimension_numbers = #tpu.dot_dimension_numbers<[1], [0], [0], [1], [0, 0, 1, 1], [], []>} : vector<8x128xbf16>, vector<128x128xbf16>, vector<8x128xf32> -> vector<8x128xf32>
    %c1_115 = arith.constant 1 : index
    %c0_116 = arith.constant 0 : index
    %c0_117 = arith.constant 0 : index
    %297 = vector.load %arg7[%c1_115, %c0_116, %c0_117] : memref<2x1x128xf32, #tpu.memory_space<vmem>>, vector<1x1x128xf32>
    %298 = vector.shape_cast %297 : vector<1x1x128xf32> to vector<1x128xf32>
    %299 = vector.broadcast %298 : vector<1x128xf32> to vector<8x128xf32>
    %300 = arith.addf %296, %299 : vector<8x128xf32>
    %301 = arith.addf %191, %300 : vector<8x128xf32>
    %c1_118 = arith.constant 1 : index
    %c0_119 = arith.constant 0 : index
    %c0_120 = arith.constant 0 : index
    %302 = vector.load %arg8[%c1_118, %c0_119, %c0_120] : memref<2x1x128xf32, #tpu.memory_space<vmem>>, vector<1x1x128xf32>
    %303 = vector.shape_cast %302 : vector<1x1x128xf32> to vector<1x128xf32>
    %c1_121 = arith.constant 1 : index
    %c0_122 = arith.constant 0 : index
    %c0_123 = arith.constant 0 : index
    %304 = vector.load %arg9[%c1_121, %c0_122, %c0_123] : memref<2x1x128xf32, #tpu.memory_space<vmem>>, vector<1x1x128xf32>
    %305 = vector.shape_cast %304 : vector<1x1x128xf32> to vector<1x128xf32>
    %cst_124 = arith.constant dense<0.000000e+00> : vector<8xf32>
    %306 = vector.multi_reduction <add>, %301, %cst_124 [1] : vector<8x128xf32> to vector<8xf32>
    %307 = vector.shape_cast %306 : vector<8xf32> to vector<8x1xf32>
    %cst_125 = arith.constant 1.280000e+02 : f32
    %308 = vector.broadcast %cst_125 : f32 to vector<8x1xf32>
    %309 = arith.divf %307, %308 : vector<8x1xf32>
    %310 = vector.broadcast %309 : vector<8x1xf32> to vector<8x128xf32>
    %311 = arith.subf %301, %310 : vector<8x128xf32>
    %312 = arith.mulf %311, %311 : vector<8x128xf32>
    %cst_126 = arith.constant dense<0.000000e+00> : vector<8xf32>
    %313 = vector.multi_reduction <add>, %312, %cst_126 [1] : vector<8x128xf32> to vector<8xf32>
    %314 = vector.shape_cast %313 : vector<8xf32> to vector<8x1xf32>
    %cst_127 = arith.constant 1.280000e+02 : f32
    %315 = vector.broadcast %cst_127 : f32 to vector<8x1xf32>
    %316 = arith.divf %314, %315 : vector<8x1xf32>
    %cst_128 = arith.constant 9.99999974E-6 : f32
    %317 = vector.broadcast %cst_128 : f32 to vector<8x1xf32>
    %318 = arith.addf %316, %317 : vector<8x1xf32>
    %319 = math.rsqrt %318 : vector<8x1xf32>
    %320 = vector.broadcast %319 : vector<8x1xf32> to vector<8x128xf32>
    %321 = arith.mulf %311, %320 : vector<8x128xf32>
    %322 = vector.broadcast %303 : vector<1x128xf32> to vector<8x128xf32>
    %323 = arith.mulf %321, %322 : vector<8x128xf32>
    %324 = vector.broadcast %305 : vector<1x128xf32> to vector<8x128xf32>
    %325 = arith.addf %323, %324 : vector<8x128xf32>
    %326 = arith.truncf %325 : vector<8x128xf32> to vector<8x128xbf16>
    %c1_129 = arith.constant 1 : index
    %c0_130 = arith.constant 0 : index
    %c0_131 = arith.constant 0 : index
    %327 = vector.load %arg10[%c1_129, %c0_130, %c0_131] : memref<2x128x256xbf16, #tpu.memory_space<vmem>>, vector<1x128x256xbf16>
    %328 = vector.shape_cast %327 : vector<1x128x256xbf16> to vector<128x256xbf16>
    %cst_132 = arith.constant dense<0.000000e+00> : vector<8x256xf32>
    %329 = tpu.matmul %326, %328, %cst_132 {dimension_numbers = #tpu.dot_dimension_numbers<[1], [0], [0], [1], [0, 0, 1, 1], [], []>} : vector<8x128xbf16>, vector<128x256xbf16>, vector<8x256xf32> -> vector<8x256xf32>
    %c1_133 = arith.constant 1 : index
    %c0_134 = arith.constant 0 : index
    %c0_135 = arith.constant 0 : index
    %330 = vector.load %arg11[%c1_133, %c0_134, %c0_135] : memref<2x1x256xf32, #tpu.memory_space<vmem>>, vector<1x1x256xf32>
    %331 = vector.shape_cast %330 : vector<1x1x256xf32> to vector<1x256xf32>
    %332 = vector.broadcast %331 : vector<1x256xf32> to vector<8x256xf32>
    %333 = arith.addf %329, %332 : vector<8x256xf32>
    %cst_136 = arith.constant 0.000000e+00 : f32
    %334 = vector.broadcast %cst_136 : f32 to vector<8x256xf32>
    %335 = arith.maximumf %333, %334 : vector<8x256xf32>
    %336 = arith.truncf %335 : vector<8x256xf32> to vector<8x256xbf16>
    %c1_137 = arith.constant 1 : index
    %c0_138 = arith.constant 0 : index
    %c0_139 = arith.constant 0 : index
    %337 = vector.load %arg12[%c1_137, %c0_138, %c0_139] : memref<2x256x128xbf16, #tpu.memory_space<vmem>>, vector<1x256x128xbf16>
    %338 = vector.shape_cast %337 : vector<1x256x128xbf16> to vector<256x128xbf16>
    %cst_140 = arith.constant dense<0.000000e+00> : vector<8x128xf32>
    %339 = tpu.matmul %336, %338, %cst_140 {dimension_numbers = #tpu.dot_dimension_numbers<[1], [0], [0], [1], [0, 0, 1, 1], [], []>} : vector<8x256xbf16>, vector<256x128xbf16>, vector<8x128xf32> -> vector<8x128xf32>
    %c1_141 = arith.constant 1 : index
    %c0_142 = arith.constant 0 : index
    %c0_143 = arith.constant 0 : index
    %340 = vector.load %arg13[%c1_141, %c0_142, %c0_143] : memref<2x1x128xf32, #tpu.memory_space<vmem>>, vector<1x1x128xf32>
    %341 = vector.shape_cast %340 : vector<1x1x128xf32> to vector<1x128xf32>
    %342 = vector.broadcast %341 : vector<1x128xf32> to vector<8x128xf32>
    %343 = arith.addf %339, %342 : vector<8x128xf32>
    %344 = arith.addf %325, %343 : vector<8x128xf32>
    %c1_144 = arith.constant 1 : index
    %c0_145 = arith.constant 0 : index
    %c0_146 = arith.constant 0 : index
    %345 = vector.load %arg14[%c1_144, %c0_145, %c0_146] : memref<2x1x128xf32, #tpu.memory_space<vmem>>, vector<1x1x128xf32>
    %346 = vector.shape_cast %345 : vector<1x1x128xf32> to vector<1x128xf32>
    %c1_147 = arith.constant 1 : index
    %c0_148 = arith.constant 0 : index
    %c0_149 = arith.constant 0 : index
    %347 = vector.load %arg15[%c1_147, %c0_148, %c0_149] : memref<2x1x128xf32, #tpu.memory_space<vmem>>, vector<1x1x128xf32>
    %348 = vector.shape_cast %347 : vector<1x1x128xf32> to vector<1x128xf32>
    %cst_150 = arith.constant dense<0.000000e+00> : vector<8xf32>
    %349 = vector.multi_reduction <add>, %344, %cst_150 [1] : vector<8x128xf32> to vector<8xf32>
    %350 = vector.shape_cast %349 : vector<8xf32> to vector<8x1xf32>
    %cst_151 = arith.constant 1.280000e+02 : f32
    %351 = vector.broadcast %cst_151 : f32 to vector<8x1xf32>
    %352 = arith.divf %350, %351 : vector<8x1xf32>
    %353 = vector.broadcast %352 : vector<8x1xf32> to vector<8x128xf32>
    %354 = arith.subf %344, %353 : vector<8x128xf32>
    %355 = arith.mulf %354, %354 : vector<8x128xf32>
    %cst_152 = arith.constant dense<0.000000e+00> : vector<8xf32>
    %356 = vector.multi_reduction <add>, %355, %cst_152 [1] : vector<8x128xf32> to vector<8xf32>
    %357 = vector.shape_cast %356 : vector<8xf32> to vector<8x1xf32>
    %cst_153 = arith.constant 1.280000e+02 : f32
    %358 = vector.broadcast %cst_153 : f32 to vector<8x1xf32>
    %359 = arith.divf %357, %358 : vector<8x1xf32>
    %cst_154 = arith.constant 9.99999974E-6 : f32
    %360 = vector.broadcast %cst_154 : f32 to vector<8x1xf32>
    %361 = arith.addf %359, %360 : vector<8x1xf32>
    %362 = math.rsqrt %361 : vector<8x1xf32>
    %363 = vector.broadcast %362 : vector<8x1xf32> to vector<8x128xf32>
    %364 = arith.mulf %354, %363 : vector<8x128xf32>
    %365 = vector.broadcast %346 : vector<1x128xf32> to vector<8x128xf32>
    %366 = arith.mulf %364, %365 : vector<8x128xf32>
    %367 = vector.broadcast %348 : vector<1x128xf32> to vector<8x128xf32>
    %368 = arith.addf %366, %367 : vector<8x128xf32>
    %369 = arith.truncf %368 : vector<8x128xf32> to vector<8x128xbf16>
    %c0_155 = arith.constant 0 : index
    %c0_156 = arith.constant 0 : index
    %370 = vector.load %arg16[%c0_155, %c0_156] : memref<128x256xbf16, #tpu.memory_space<vmem>>, vector<128x256xbf16>
    %cst_157 = arith.constant dense<0.000000e+00> : vector<8x256xf32>
    %371 = tpu.matmul %369, %370, %cst_157 {dimension_numbers = #tpu.dot_dimension_numbers<[1], [0], [0], [1], [0, 0, 1, 1], [], []>} : vector<8x128xbf16>, vector<128x256xbf16>, vector<8x256xf32> -> vector<8x256xf32>
    %c0_158 = arith.constant 0 : index
    %c0_159 = arith.constant 0 : index
    %372 = vector.load %arg17[%c0_158, %c0_159] : memref<1x256xf32, #tpu.memory_space<vmem>>, vector<1x256xf32>
    %373 = vector.broadcast %372 : vector<1x256xf32> to vector<8x256xf32>
    %374 = arith.addf %371, %373 : vector<8x256xf32>
    %c0_160 = arith.constant 0 : index
    %c0_161 = arith.constant 0 : index
    %c0_162 = arith.constant 0 : index
    %375 = vector.load %arg18[%c0_160, %c0_161, %c0_162] : memref<1x8x256xf32, #tpu.memory_space<vmem>>, vector<1x8x256xf32>
    %376 = vector.shape_cast %375 : vector<1x8x256xf32> to vector<8x256xf32>
    %377 = vector.shape_cast %374 : vector<8x256xf32> to vector<1x8x256xf32>
    tpu.vector_store %arg18[%c0_160, %c0_161, %c0_162], %377 {strides = array<i32>} : memref<1x8x256xf32, #tpu.memory_space<vmem>>, vector<1x8x256xf32>,
    return
  }
  func.func @transform_0(%arg0: i32) -> (i32, i32, i32) {
    %c0_i32 = arith.constant 0 : i32
    %c0_i32_0 = arith.constant 0 : i32
    %c0_i32_1 = arith.constant 0 : i32
    return %arg0, %c0_i32, %c0_i32_0 : i32, i32, i32
  }
  func.func @transform_1(%arg0: i32) -> (i32, i32) {
    %c0_i32 = arith.constant 0 : i32
    %c0_i32_0 = arith.constant 0 : i32
    %c0_i32_1 = arith.constant 0 : i32
    return %c0_i32, %c0_i32_0 : i32, i32
  }
  func.func @transform_2(%arg0: i32) -> (i32, i32) {
    %c0_i32 = arith.constant 0 : i32
    %c0_i32_0 = arith.constant 0 : i32
    %c0_i32_1 = arith.constant 0 : i32
    return %c0_i32, %c0_i32_0 : i32, i32
  }
  func.func @transform_3(%arg0: i32) -> (i32, i32, i32) {
    %c0_i32 = arith.constant 0 : i32
    %c0_i32_0 = arith.constant 0 : i32
    %c0_i32_1 = arith.constant 0 : i32
    %c0_i32_2 = arith.constant 0 : i32
    return %c0_i32, %c0_i32_0, %c0_i32_1 : i32, i32, i32
  }
  func.func @transform_4(%arg0: i32) -> (i32, i32, i32) {
    %c0_i32 = arith.constant 0 : i32
    %c0_i32_0 = arith.constant 0 : i32
    %c0_i32_1 = arith.constant 0 : i32
    %c0_i32_2 = arith.constant 0 : i32
    return %c0_i32, %c0_i32_0, %c0_i32_1 : i32, i32, i32
  }
  func.func @transform_5(%arg0: i32) -> (i32, i32, i32) {
    %c0_i32 = arith.constant 0 : i32
    %c0_i32_0 = arith.constant 0 : i32
    %c0_i32_1 = arith.constant 0 : i32
    %c0_i32_2 = arith.constant 0 : i32
    return %c0_i32, %c0_i32_0, %c0_i32_1 : i32, i32, i32
  }
  func.func @transform_6(%arg0: i32) -> (i32, i32, i32) {
    %c0_i32 = arith.constant 0 : i32
    %c0_i32_0 = arith.constant 0 : i32
    %c0_i32_1 = arith.constant 0 : i32
    %c0_i32_2 = arith.constant 0 : i32
    return %c0_i32, %c0_i32_0, %c0_i32_1 : i32, i32, i32
  }
  func.func @transform_7(%arg0: i32) -> (i32, i32, i32) {
    %c0_i32 = arith.constant 0 : i32
    %c0_i32_0 = arith.constant 0 : i32
    %c0_i32_1 = arith.constant 0 : i32
    %c0_i32_2 = arith.constant 0 : i32
    return %c0_i32, %c0_i32_0, %c0_i32_1 : i32, i32, i32
  }
  func.func @transform_8(%arg0: i32) -> (i32, i32, i32) {
    %c0_i32 = arith.constant 0 : i32
    %c0_i32_0 = arith.constant 0 : i32
    %c0_i32_1 = arith.constant 0 : i32
    %c0_i32_2 = arith.constant 0 : i32
    return %c0_i32, %c0_i32_0, %c0_i32_1 : i32, i32, i32
  }
  func.func @transform_9(%arg0: i32) -> (i32, i32, i32) {
    %c0_i32 = arith.constant 0 : i32
    %c0_i32_0 = arith.constant 0 : i32
    %c0_i32_1 = arith.constant 0 : i32
    %c0_i32_2 = arith.constant 0 : i32
    return %c0_i32, %c0_i32_0, %c0_i32_1 : i32, i32, i32
  }
  func.func @transform_10(%arg0: i32) -> (i32, i32, i32) {
    %c0_i32 = arith.constant 0 : i32
    %c0_i32_0 = arith.constant 0 : i32
    %c0_i32_1 = arith.constant 0 : i32
    %c0_i32_2 = arith.constant 0 : i32
    return %c0_i32, %c0_i32_0, %c0_i32_1 : i32, i32, i32
  }
  func.func @transform_11(%arg0: i32) -> (i32, i32, i32) {
    %c0_i32 = arith.constant 0 : i32
    %c0_i32_0 = arith.constant 0 : i32
    %c0_i32_1 = arith.constant 0 : i32
    %c0_i32_2 = arith.constant 0 : i32
    return %c0_i32, %c0_i32_0, %c0_i32_1 : i32, i32, i32
  }
  func.func @transform_12(%arg0: i32) -> (i32, i32, i32) {
    %c0_i32 = arith.constant 0 : i32
    %c0_i32_0 = arith.constant 0 : i32
    %c0_i32_1 = arith.constant 0 : i32
    %c0_i32_2 = arith.constant 0 : i32
    return %c0_i32, %c0_i32_0, %c0_i32_1 : i32, i32, i32
  }
  func.func @transform_13(%arg0: i32) -> (i32, i32, i32) {
    %c0_i32 = arith.constant 0 : i32
    %c0_i32_0 = arith.constant 0 : i32
    %c0_i32_1 = arith.constant 0 : i32
    %c0_i32_2 = arith.constant 0 : i32
    return %c0_i32, %c0_i32_0, %c0_i32_1 : i32, i32, i32
  }
  func.func @transform_14(%arg0: i32) -> (i32, i32, i32) {
    %c0_i32 = arith.constant 0 : i32
    %c0_i32_0 = arith.constant 0 : i32
    %c0_i32_1 = arith.constant 0 : i32
    %c0_i32_2 = arith.constant 0 : i32
    return %c0_i32, %c0_i32_0, %c0_i32_1 : i32, i32, i32
  }
  func.func @transform_15(%arg0: i32) -> (i32, i32) {
    %c0_i32 = arith.constant 0 : i32
    %c0_i32_0 = arith.constant 0 : i32
    %c0_i32_1 = arith.constant 0 : i32
    return %c0_i32, %c0_i32_0 : i32, i32
  }
  func.func @transform_16(%arg0: i32) -> (i32, i32) {
    %c0_i32 = arith.constant 0 : i32
    %c0_i32_0 = arith.constant 0 : i32
    %c0_i32_1 = arith.constant 0 : i32
    return %c0_i32, %c0_i32_0 : i32, i32
  }
  func.func @transform_17(%arg0: i32) -> (i32, i32, i32) {
    %c0_i32 = arith.constant 0 : i32
    %c0_i32_0 = arith.constant 0 : i32
    %c0_i32_1 = arith.constant 0 : i32
    return %arg0, %c0_i32, %c0_i32_0 : i32, i32, i32
  }
}

</mosaic_0001>

<bundles_post_ra>
// kernel: transformer_forward.1
= control target key start
LH: loop header
LB: loop body
LE: loop exit
PB: predicated region body
PF: predicated region fallthrough
CT: control target
= control target key end

     0   :  { %s4784_s0 = inlined_call_operand.vmem [shape: s32[2,8,1], index: 0, kind: input, shape index: {}]   ;;  %s4785_s1 = inlined_call_operand.hbm [shape: bf16[256,128], index: 1, kind: input, shape index: {}]   ;;  %s4786_s2 = inlined_call_operand.hbm [shape: f32[64,128], index: 2, kind: input, shape index: {}]   ;;  %s4787_s3 = inlined_call_operand.hbm [shape: bf16[2,128,384], index: 3, kind: input, shape index: {}]   ;;  %s4788_s4 = inlined_call_operand.vmem [shape: f32[2,1,384], index: 4, kind: input, shape index: {}]   ;;  %s4789_s5 = inlined_call_operand.hbm [shape: bf16[2,128,128], index: 5, kind: input, shape index: {}]   ;;  %s4790_s6 = inlined_call_operand.vmem [shape: f32[2,1,128], index: 6, kind: input, shape index: {}]   ;;  %s4791_s7 = inlined_call_operand.vmem [shape: f32[2,1,128], index: 7, kind: input, shape index: {}]   ;;  %s4792_s8 = inlined_call_operand.vmem [shape: f32[2,1,128], index: 8, kind: input, shape index: {}]   ;;  %s4793_s9 = inlined_call_operand.hbm [shape: bf16[2,128,256], index: 9, kind: input, shape index: {}]   ;;  %s4794_s10 = inlined_call_operand.vmem [shape: f32[2,1,256], index: 10, kind: input, shape index: {}]   ;;  %s4795_s11 = inlined_call_operand.hbm [shape: bf16[2,256,128], index: 11, kind: input, shape index: {}]   ;;  %s4796_s12 = inlined_call_operand.vmem [shape: f32[2,1,128], index: 12, kind: input, shape index: {}]   ;;  %s4797_s13 = inlined_call_operand.vmem [shape: f32[2,1,128], index: 13, kind: input, shape index: {}]   ;;  %s4798_s14 = inlined_call_operand.vmem [shape: f32[2,1,128], index: 14, kind: input, shape index: {}]   ;;  %s4799_s15 = inlined_call_operand.hbm [shape: bf16[128,256], index: 15, kind: input, shape index: {}]   ;;  %s4800_s16 = inlined_call_operand.hbm [shape: f32[1,256], index: 16, kind: input, shape index: {}]   ;;  %s4801_s17 = inlined_call_operand.hbm [shape: f32[2,8,256], index: 17, kind: output, shape index: {}]  }
   0x1   :  { %4813 = sst [smem:[#allocation31_spill]] %s4784_s0 }
   0x2   :  { %4814 = sst [smem:[#allocation32_spill]] %s4785_s1 }
   0x3   :  { %4815 = sst [smem:[#allocation33_spill]] %s4786_s2 }
   0x4   :  { %4816 = sst [smem:[#allocation34_spill]] %s4789_s5 }
   0x5   :  { %4817 = sst [smem:[#allocation35_spill]] %s4798_s14 }
   0x6   :  { %4818 = sst [smem:[#allocation36_spill]] %s4801_s17 }
   0x7   :  { %22 = vsyncpa [#allocation3], 0 }
   0x8   :  { %23 = vsyncpa [#allocation6], 0 }
   0x9   :  { %24 = vsyncpa [#allocation9], 0 }
   0xa   :  { %25 = vsyncpa [#allocation12], 0 }
   0xb   :  { %26 = vsyncpa [#allocation15], 0 }
   0xc   :  { %27 = vsyncpa [#allocation4], 0 }
   0xd   :  { %29 = vsyncpa [#allocation4 + $0x1], 0  ;;  %s4416_s24 = smov 0   ;;  %s4418_s25 = smov 0  }
   0xe   :  { %s4420_s26 = smov 0   ;;  %s4422_s27 = smov 0  }
   0xf LB: > { %4819 = sst [smem:[#allocation23_spill]] %s4292_s24  ;;  %s4437_s28 = sadd.s32 4294967295, %s4304_s27   ;;  %s4304_s27 = sphi %s4422_s27, %s4845_s27   ;;  %s4300_s26 = sphi %s4420_s26, %s4848_s26   ;;  %s4296_s25 = sphi %s4418_s25, %s4847_s25   ;;  %s4292_s24 = sphi %s4416_s24, %s4846_s24  }
  0x10   : > { %4820 = sst [smem:[#allocation24_spill]] %s4296_s25  ;;  %s2937_s29 = sadd.s32 4294967294, %s4304_s27  }
  0x11   : > { %4821 = sst [smem:[#allocation25_spill]] %s4300_s26  ;;  %s4441_s0 = sadd.s32 1, %s4304_s27  }
  0x12   : > { %4822 = sst [smem:[#allocation26_spill]] %s4304_s27  ;;  %s404_s30 = sadd.s32 1, %s4300_s26 }
  0x13   : > { %4823 = sst [smem:[#allocation27_spill]] %s4441_s0  ;;  %s401_s18 = ssub.s32 %s4304_s27, %s4441_s0 }
  0x14   : > { %p414_p0 = scmp.ne.s32.totalorder %s4300_s26, %s4296_s25  ;;  %p402_p1 = scmp.eq.s32.totalorder %s401_s18, 0 }
  0x15   : > { %p415_p2 = scmp.eq.s32.totalorder %s4437_s28, 1  ;;  %p420_p3 = scmp.ne.s32.totalorder %s4296_s25, %s4292_s24 }
  0x16   : > { %p421_p4 = scmp.eq.s32.totalorder %s2937_s29, 1  ;;  %p2938_p7 = scmp.ge.s32.totalorder %s4304_s27, 1 }
  0x17   : > { %s4452_s19 = scalar_select %p402_p1, %s4300_s26, %s404_s30  }
  0x18   : > { %p4454_p5 = por %p415_p2, %p414_p0  ;;  %p4458_p6 = por %p421_p4, %p420_p3 }
  0x19   : > { %4824 = sst [smem:[#allocation28_spill]] %s4452_s19  ;;  %p428_p8 = scmp.lt.s32.totalorder %s4304_s27, 3 }
  0x1a   : > { %s4825_s1 = scalar_select %p4454_p5, 1, 0 }
  0x1b   : > { %s4827_s20 = scalar_select %p4458_p6, 1, 0 }
  0x1c   : > { %4826 = sst [smem:[#allocation29_spill]] %s4825_s1  ;;  %p3858_p9 = scmp.eq.s32.totalorder %s4437_s28, 0 }
  0x1d   : > { %4828 = sst [smem:[#allocation30_spill]] %s4827_s20  ;;  %p4465_p10 = pnand %p2938_p7, %p428_p8 }
  0x1e   : > { %s4830_s2 = sld [smem:[#allocation33_spill]]  ;;  %s4306_s30 = smov [#allocation5]  }
  0x1f   : > { %p3829_p11 = pneg %p4465_p10  ;;  %s456_s18 = sshll.u32 %s4306_s30, 4  ;;  %s457_s18 = int_to_ptr.vmem [resolvable:$true] %s456_s18 }
  0x20   : > { %s4832_s5 = sld [smem:[#allocation34_spill]]  ;;  %s4307_s22 = smov [#allocation8]  }
  0x21   : > { %p4476_p12 = pnand %p3858_p9, %p3829_p11  ;;  %s484_s23 = sshll.u32 %s4307_s22, 4  ;;  %s485_s23 = int_to_ptr.vmem [resolvable:$true] %s484_s23 }
  0x22   : > { %s522_s24 = sshll.u32 %s4795_s11, 4  ;;  %s4308_s27 = smov 64   ;;  %s523_s24 = int_to_ptr.hbm [resolvable:$true] %s522_s24 }
  0x23   : > { %s4309_s1 = smov 4   ;;  %s4310_s25 = smov [#allocation11]  }
  0x24   : > { %s454_s29 = sshll.u32 %s4830_s2, 4  ;;  %s524_s14 = sshll.u32 %s4310_s25, 4  ;;  %s455_s29 = int_to_ptr.hbm [resolvable:$true] %s454_s29  ;;  %s525_s14 = int_to_ptr.vmem [resolvable:$true] %s524_s14 }
  0x25   : > { %3835 = dma.hbm_to_vmem [thread:$0]  (!%p4476_p12), %s455_s29, 128, %s457_s18, [#allocation6]  }
  0x26   : > { %s482_s20 = sshll.u32 %s4832_s5, 4  ;;  %s4833_s5 = sld [smem:[#allocation32_spill]]  ;;  %s483_s20 = int_to_ptr.hbm [resolvable:$true] %s482_s20 }
  0x27   : > { %3841 = dma.hbm_to_vmem [thread:$0]  (!%p4476_p12), %s483_s20, 2048, %s485_s23, [#allocation9], %s4308_s27, %s4308_s27, %s4309_s1  }
  0x28   : > { %3847 = dma.hbm_to_vmem [thread:$0]  (!%p4476_p12), %s523_s24, 4096, %s525_s14, [#allocation12], %s4308_s27, %s4308_s27, %s4309_s1  }
  0x29   : > { %s4311_s2 = smov [#allocation2]   ;;  %s465_s30 = sshll.u32 %s4787_s3, 4  ;;  %s466_s30 = int_to_ptr.hbm [resolvable:$true] %s465_s30 }
  0x2a   : > { %s441_s29 = sshll.u32 %s4311_s2, 4  ;;  %s4312_s20 = smov [#allocation7]   ;;  %s442_s29 = int_to_ptr.vmem [resolvable:$true] %s441_s29 }
  0x2b   : > { %s505_s26 = sshll.u32 %s4793_s9, 4  ;;  %s4313_s0 = smov 192   ;;  %s506_s26 = int_to_ptr.hbm [resolvable:$true] %s505_s26 }
  0x2c   : > { %s439_s17 = sshll.u32 %s4833_s5, 4  ;;  %s467_s5 = sshll.u32 %s4312_s20, 4  ;;  %s440_s17 = int_to_ptr.hbm [resolvable:$true] %s439_s17  ;;  %s468_s5 = int_to_ptr.vmem [resolvable:$true] %s467_s5 }
  0x2d   : > { %3832 = dma.hbm_to_vmem [thread:$0]  (!%p4476_p12), %s440_s17, 2048, %s442_s29, [#allocation3], %s4308_s27, %s4308_s27, %s4309_s1  }
  0x2e   : > { %s4314_s14 = smov 12   ;;  %s4315_s24 = smov [#allocation10]  }
  0x2f   : > { %3838 = dma.hbm_to_vmem [thread:$0]  (!%p4476_p12), %s466_s30, 6144, %s468_s5, [#allocation6], %s4313_s0, %s4313_s0, %s4314_s14  }
  0x30   : > { %s507_s2 = sshll.u32 %s4315_s24, 4  ;;  %s4316_s18 = smov 128   ;;  %s508_s2 = int_to_ptr.vmem [resolvable:$true] %s507_s2 }
  0x31   : > { %s4317_s22 = smov 8   ;;  %s545_s1 = sshll.u32 %s4799_s15, 4  ;;  %s546_s1 = int_to_ptr.hbm [resolvable:$true] %s545_s1 }
  0x32   : > { %3844 = dma.hbm_to_vmem [thread:$0]  (!%p4476_p12), %s506_s26, 4096, %s508_s2, [#allocation9], %s4316_s18, %s4316_s18, %s4317_s22  }
  0x33   : > { %s4318_s29 = smov [#allocation13]   ;;  %s560_s30 = sshll.u32 %s4800_s16, 4  ;;  %s561_s30 = int_to_ptr.hbm [resolvable:$true] %s560_s30 }
  0x34   : > { %s547_s20 = sshll.u32 %s4318_s29, 4  ;;  %s4319_s5 = smov [#allocation14]   ;;  %s548_s20 = int_to_ptr.vmem [resolvable:$true] %s547_s20 }
  0x35   : > { %3850 = dma.hbm_to_vmem [thread:$0]  (!%p4476_p12), %s546_s1, 2048, %s548_s20, [#allocation12], %s4316_s18, %s4316_s18, %s4317_s22  }
  0x36   : > { %s562_s0 = sshll.u32 %s4319_s5, 4  ;;  %582 = sbr.rel (%p4465_p10) target bundleno = 4552 (0x11c8), region = 88  ;;  %s563_s0 = int_to_ptr.vmem [resolvable:$true] %s562_s0 }
  0x37   : > { %3853 = dma.hbm_to_vmem [thread:$0]  (!%p4476_p12), %s561_s30, 32, %s563_s0, [#allocation15]  }
  0x3b   : > { %4267 = dma.done.wait (%p3858_p9), [#allocation3], 2048  }
  0x3c   : > { %4269 = vsyncadd (%p3858_p9), [#allocation3], 4294965248 }
  0x3d   : > { %4271 = dma.done.wait (%p3858_p9), [#allocation6], 6272  }
  0x3e   : > { %4273 = vsyncadd (%p3858_p9), [#allocation6], 4294961024 }
  0x3f   : > { %4275 = dma.done.wait (%p3858_p9), [#allocation9], 6144  }
  0x40   : > { %4277 = vsyncadd (%p3858_p9), [#allocation9], 4294961152 }
  0x41   : > { %4279 = dma.done.wait (%p3858_p9), [#allocation12], 6144  }
  0x42   : > { %4281 = vsyncadd (%p3858_p9), [#allocation12], 4294961152 }
  0x43   : > { %4283 = dma.done.wait (%p3858_p9), [#allocation15], 32  }
  0x44   : > { %4285 = vsyncadd (%p3858_p9), [#allocation15], 4294967264  ;;  %p669_p13 = scmp.lt.s32.totalorder %s4437_s28, 1  ;;  %v4320_v0 = vmov 0   ;;  %s4834_s24 = sld [smem:[#allocation31_spill]]  ;;  %v3641_v2 = vld [vmem:[#allocation2 + $0x38] sm:$0xff] }
  0x45   : > { %3927 = vset.pattern.permute.xlu0 %v4320_v0  ;;  %v3649_v3 = vld [vmem:[#allocation2 + $0x78] sm:$0xff]  ;;  %818 = vmatpush.bf16.msra.mxu0 %v3641_v2  ;;  %v3640_v4 = vld [vmem:[#allocation2 + $0x30] sm:$0xff]  ;;  %v3639_v6 = vld [vmem:[#allocation2 + $0x28] sm:$0xff]  ;;  %v675_v2 = vlaneseq  ;;  %vm1096_vm4 = vcmask 1043456   ;;  %vm1058_vm5 = vcmask 261120   ;;  %s4322_s17 = smov 96  }
  0x46   : > { %s670_s19 = scalar_select %p669_p13, %s4437_s28, 1  ;;  %831 = vmatpush.bf16.msra.mxu1 %v3649_v3  ;;  %v3648_v5 = vld [vmem:[#allocation2 + $0x70] sm:$0xff]  ;;  %v3647_v7 = vld [vmem:[#allocation2 + $0x68] sm:$0xff]  ;;  %v3638_v8 = vld [vmem:[#allocation2 + $0x20] sm:$0xff]  ;;  %vm1080_vm7 = vcmask 64512   ;;  %vm1303_vm8 = vcmask 523264  }
  0x47   : > { %v3646_v9 = vld [vmem:[#allocation2 + $0x60] sm:$0xff]  ;;  %v3637_v10 = vld [vmem:[#allocation2 + $0x18] sm:$0xff]  ;;  %v3636_v12 = vld [vmem:[#allocation2 + $0x10] sm:$0xff]  ;;  %s4323_s27 = smov 32   ;;  %s4324_s1 = smov 64   ;;  %vm1305_vm9 = vcmask 785408  }
  0x48   : > { %s2958_s21 = sshll.u32 %s670_s19, 3  ;;  %v3645_v11 = vld [vmem:[#allocation2 + $0x58] sm:$0xff]  ;;  %v3644_v13 = vld [vmem:[#allocation2 + $0x50] sm:$0xff]  ;;  %v3635_v14 = vld [vmem:[#allocation2 + $0x8] sm:$0xff]  ;;  %s4837_s22 = sld [smem:[#allocation35_spill]] }
  0x49   : > { %819 = vmatpush.bf16.msra.mxu0 %v3640_v4  ;;  %v3643_v15 = vld [vmem:[#allocation2 + $0x48] sm:$0xff]  ;;  %v3634_v16 = vld [vmem:[#allocation2] sm:$0xff]  ;;  %v3115_v18 = vld [vmem:[#allocation7 + $0xa8] sm:$0xf]  ;;  %s4838_s26 = sld [smem:[#allocation24_spill]] }
  0x4a   : > { %s672_s2 = scalar_lea.vmem %s4834_s24, %s2958_s21  ;;  %832 = vmatpush.bf16.msra.mxu1 %v3648_v5  ;;  %v3642_v17 = vld [vmem:[#allocation2 + $0x40] sm:$0xff]  ;;  %v3672_v19 = vld [vmem:[#allocation7 + $0xb0] sm:$0xf0]  ;;  %v3671_v20 = vld [vmem:[#allocation7 + $0xac] sm:$0xf]  ;;  %s4839_s25 = sld [smem:[#allocation36_spill]] }
  0x4b   : > { %v674_v1 = vld [vmem:[%s672_s2] sm:$0xff]  ;;  %v3116_v21 = vor.u32 %v3672_v19, %v3115_v18  ;;  %v3123_v23 = vld [vmem:[#allocation7 + $0xb0] sm:$0xf]  ;;  %v3668_v29 = vld [vmem:[#allocation7 + $0x94] sm:$0xf] }
  0x4c   : > { %679 = vperm.xlu0 %3927, %v674_v1   ;;  %v3117_v22 = vld [vmem:[#allocation7 + $0xb4] sm:$0xf0]  ;;  %v3673_v24 = vld [vmem:[#allocation7 + $0xb8] sm:$0xf0]  ;;  %v3103_v27 = vld [vmem:[#allocation7 + $0x90] sm:$0xf] }
  0x4d   : > { %820 = vmatpush.bf16.msra.mxu0 %v3639_v6  ;;  %v3120_v25 = vor.u32 %v3671_v20, %v3117_v22  ;;  %v3124_v26 = vor.u32 %v3673_v24, %v3123_v23  ;;  %v3669_v28 = vld [vmem:[#allocation7 + $0x98] sm:$0xf0]  ;;  %1016 = vmatpush.bf16.msra.mxu2 %v3116_v21  ;;  %v3105_v31 = vld [vmem:[#allocation7 + $0x9c] sm:$0xf0]  ;;  %v3111_v32 = vld [vmem:[#allocation7 + $0x98] sm:$0xf] }
  0x4e   : > { %833 = vmatpush.bf16.msra.mxu1 %v3647_v7  ;;  %v3104_v30 = vor.u32 %v3669_v28, %v3103_v27  ;;  %v3670_v33 = vld [vmem:[#allocation7 + $0xa0] sm:$0xf0]  ;;  %v3108_v34 = vor.u32 %v3668_v29, %v3105_v31  ;;  %v3091_v36 = vld [vmem:[#allocation7 + $0x78] sm:$0xf]  ;;  %v3665_v38 = vld [vmem:[#allocation7 + $0x7c] sm:$0xf] }
  0x4f   : > { %1029 = vmatpush.bf16.msra.mxu3 %v3120_v25  ;;  %v3112_v35 = vor.u32 %v3670_v33, %v3111_v32  ;;  %v3666_v37 = vld [vmem:[#allocation7 + $0x80] sm:$0xf0]  ;;  %v3093_v39 = vld [vmem:[#allocation7 + $0x84] sm:$0xf0]  ;;  %v3099_v40 = vld [vmem:[#allocation7 + $0x80] sm:$0xf] }
  0x50   : > { %v3667_v41 = vld [vmem:[#allocation7 + $0x88] sm:$0xf0]  ;;  %v3092_v42 = vor.u32 %v3666_v37, %v3091_v36  ;;  %v3096_v43 = vor.u32 %v3665_v38, %v3093_v39  ;;  %v3079_v45 = vld [vmem:[#allocation7 + $0x60] sm:$0xf]  ;;  %v3662_v47 = vld [vmem:[#allocation7 + $0x64] sm:$0xf]  ;;  %s4840_s23 = smov %s4839_s25 }
  0x51   : > { %821 = vmatpush.bf16.msra.mxu0 %v3638_v8  ;;  %1017 = vmatpush.bf16.msra.mxu2 %v3104_v30  ;;  %v3100_v44 = vor.u32 %v3667_v41, %v3099_v40  ;;  %v3663_v46 = vld [vmem:[#allocation7 + $0x68] sm:$0xf0]  ;;  %v3081_v48 = vld [vmem:[#allocation7 + $0x6c] sm:$0xf0]  ;;  %v3087_v49 = vld [vmem:[#allocation7 + $0x68] sm:$0xf] }
  0x52   : > { %834 = vmatpush.bf16.msra.mxu1 %v3646_v9  ;;  %v3664_v50 = vld [vmem:[#allocation7 + $0x70] sm:$0xf0]  ;;  %v3080_v51 = vor.u32 %v3663_v46, %v3079_v45  ;;  %v3084_v52 = vor.u32 %v3662_v47, %v3081_v48  ;;  %v3067_v54 = vld [vmem:[#allocation7 + $0x48] sm:$0xf]  ;;  %v3659_v56 = vld [vmem:[#allocation7 + $0x4c] sm:$0xf] }
  0x53   : > { %1030 = vmatpush.bf16.msra.mxu3 %v3108_v34  ;;  %v3088_v53 = vor.u32 %v3664_v50, %v3087_v49  ;;  %v3660_v55 = vld [vmem:[#allocation7 + $0x50] sm:$0xf0]  ;;  %v3069_v57 = vld [vmem:[#allocation7 + $0x54] sm:$0xf0]  ;;  %v3075_v58 = vld [vmem:[#allocation7 + $0x50] sm:$0xf] }
  0x54   : > { %v3661_v59 = vld [vmem:[#allocation7 + $0x58] sm:$0xf0]  ;;  %v3068_v60 = vor.u32 %v3660_v55, %v3067_v54  ;;  %v3072_v61 = vor.u32 %v3659_v56, %v3069_v57  ;;  %v3055_v63 = vld [vmem:[#allocation7 + $0x30] sm:$0xf]  ;;  %v3656_v1 = vld [vmem:[#allocation7 + $0x34] sm:$0xf] }
  0x55   : > { %822 = vmatpush.bf16.msra.mxu0 %v3637_v10  ;;  %1018 = vmatpush.bf16.msra.mxu2 %v3092_v42  ;;  %v3076_v62 = vor.u32 %v3661_v59, %v3075_v58  ;;  %v3657_v0 = vld [vmem:[#allocation7 + $0x38] sm:$0xf0]  ;;  %v3057_v3 = vld [vmem:[#allocation7 + $0x3c] sm:$0xf0]  ;;  %v3063_v4 = vld [vmem:[#allocation7 + $0x38] sm:$0xf] }
  0x56   : > { %835 = vmatpush.bf16.msra.mxu1 %v3645_v11  ;;  %v3658_v5 = vld [vmem:[#allocation7 + $0x40] sm:$0xf0]  ;;  %v3056_v6 = vor.u32 %v3657_v0, %v3055_v63  ;;  %v3060_v7 = vor.u32 %v3656_v1, %v3057_v3  ;;  %v4545_v9 = vand.u32 127, %v675_v2  ;;  %v3051_v18 = vld [vmem:[#allocation7 + $0x20] sm:$0xf]  ;;  %v721_v31 = vld [vmem:[#allocation5] sm:$0xff] }
  0x57   : > { %1031 = vmatpush.bf16.msra.mxu3 %v3096_v43  ;;  %v3064_v8 = vor.u32 %v3658_v5, %v3063_v4  ;;  %v3655_v19 = vld [vmem:[#allocation7 + $0x28] sm:$0xf0]  ;;  %v3031_v22 = vld [vmem:[#allocation7] sm:$0xf]  ;;  %v3650_v24 = vld [vmem:[#allocation7 + $0x4] sm:$0xf] }
  0x58   : > { %v677_v10 = vadd.s32 128, %v4545_v9  ;;  %v3052_v21 = vor.u32 %v3655_v19, %v3051_v18  ;;  %v3651_v23 = vld [vmem:[#allocation7 + $0x8] sm:$0xf0]  ;;  %v3039_v27 = vld [vmem:[#allocation7 + $0x8] sm:$0xf]  ;;  %s666_s29 = sand.u32 1, %s4838_s26  }
  0x59   : > { %823 = vmatpush.bf16.msra.mxu0 %v3636_v12  ;;  %1019 = vmatpush.bf16.msra.mxu2 %v3080_v51  ;;  %v4321_v12 = vmov 1.0|1.0   ;;  %v3032_v25 = vor.u32 %v3651_v23, %v3031_v22  ;;  %v3652_v28 = vld [vmem:[#allocation7 + $0x10] sm:$0xf0]  ;;  %v880_v39 = vld [vmem:[%s4788_s4] sm:$0x7] }
  0x5a   : > { %836 = vmatpush.bf16.msra.mxu1 %v3644_v13  ;;  %v3043_v13 = vld [vmem:[#allocation7 + $0x18] sm:$0xf]  ;;  %v3040_v30 = vor.u32 %v3652_v28, %v3039_v27  ;;  %v884_v40 = vperm.slane %v880_v39, 2  ;;  %v882_v43 = vperm.slane %v880_v39, 0  ;;  %s2957_s20 = sshll.u32 %s666_s29, 4  ;;  %s2783_s26 = scalar_lea.sflag [#allocation4], %s666_s29 }
  0x5b   : > { %1032 = vmatpush.bf16.msra.mxu3 %v3084_v52  ;;  %s668_s5 = scalar_lea.vmem [#allocation16], %s2957_s20  ;;  %s4242_s18 = scalar_lea.hbm %s4840_s23, 32 }
  0x5c   : > { %s2796_s19 = sshll.u32 %s668_s5, 4  ;;  %s2797_s19 = int_to_ptr.vmem [resolvable:$true] %s2796_s19 }
  0x5d   : > { %824 = vmatpush.bf16.msra.mxu0 %v3635_v14  ;;  %1020 = vmatpush.bf16.msra.mxu2 %v3068_v60  ;;  %v3654_v14 = vld [vmem:[#allocation7 + $0x20] sm:$0xf0]  ;;  %v845_v60 = vshrl.u32 %v675_v2, 7 }
  0x5e   : > { %837 = vmatpush.bf16.msra.mxu1 %v3643_v15  ;;  %v3653_v15 = vld [vmem:[#allocation7 + $0x1c] sm:$0xf] }
  0x5f   : > { %1033 = vmatpush.bf16.msra.mxu3 %v3072_v61  ;;  %vm4568_vm6 = vcmp.le.s32.totalorder %v4545_v9, %v845_v60 }
  0x61   : > { %825 = vmatpush.bf16.msra.mxu0 %v3634_v16  ;;  %1021 = vmatpush.bf16.msra.mxu2 %v3056_v6  ;;  %v3044_v16 = vor.u32 %v3654_v14, %v3043_v13 }
  0x62   : > { %838 = vmatpush.bf16.msra.mxu1 %v3642_v17  ;;  %v3045_v17 = vld [vmem:[#allocation7 + $0x24] sm:$0xf0] }
  0x63   : > { %1034 = vmatpush.bf16.msra.mxu3 %v3060_v7  ;;  %v3048_v20 = vor.u32 %v3653_v15, %v3045_v17 }
  0x65   : > { %1042 = vmatpush.bf16.msrb.mxu0 %v3124_v26  ;;  %1022 = vmatpush.bf16.msra.mxu2 %v3044_v16  ;;  %v3033_v26 = vld [vmem:[#allocation7 + $0xc] sm:$0xf0] }
  0x66   : > { %v3036_v29 = vor.u32 %v3650_v24, %v3033_v26 }
  0x67   : > { %1035 = vmatpush.bf16.msra.mxu3 %v3048_v20 }
  0x69   : > { %1043 = vmatpush.bf16.msrb.mxu0 %v3112_v35  ;;  %1023 = vmatpush.bf16.msra.mxu2 %v3032_v25 }
  0x6b   : > { %1036 = vmatpush.bf16.msra.mxu3 %v3036_v29 }
  0x6d   : > { %1044 = vmatpush.bf16.msrb.mxu0 %v3100_v44  ;;  %v883_v44 = vperm.slane %v880_v39, 1 }
  0x71   : > { %1045 = vmatpush.bf16.msrb.mxu0 %v3088_v53 }
  0x75   : > { %1046 = vmatpush.bf16.msrb.mxu0 %v3076_v62 }
  0x79   : > { %1047 = vmatpush.bf16.msrb.mxu0 %v3064_v8 }
  0x7d   : > { %1048 = vmatpush.bf16.msrb.mxu0 %v3052_v21 }
  0x81   : > { %1049 = vmatpush.bf16.msrb.mxu0 %v3040_v30 }
  0xbe   : > { %v680_v11 = vpop.permute.xlu0 %679 }
  0xbf   : > { %vm681_vm0 = vcmp.eq.s32.totalorder %v4545_v9, %v680_v11  ;;  %vm682_vm1 = vcmp.eq.s32.totalorder %v677_v10, %v680_v11 }
  0xc0   : > { %vm3025_vm2 = vmpackc.low %vm681_vm0, %vm681_vm0 }
  0xc1   : > { %3026 = vmatmul.msk.bf16.vlgmr.msra.gmra.mxu0 %vm3025_vm2, %v4321_v12  ;;  %vm3027_vm3 = vmpackc.low %vm682_vm1, %vm682_vm1 }
  0xc2   : > { %3028 = vmatmul.msk.bf16.vlgmr.msra.gmra.mxu1 %vm3027_vm3, %v4321_v12 }
 0x13e   : > { %v827_v32 = vpop.f32.mrf.mxu0 }
 0x13f   : > { %v828_v33 = vadd.f32 %v827_v32, %v721_v31  ;;  %v840_v34 = vpop.f32.mrf.mxu1 }
 0x141   : > { %v4549_v35 = vadd.f32 %v840_v34, %v828_v33 }
 0x143   : > { %v847_v36 = vpack.c.bf16 %v4549_v35, %v4549_v35 }
 0x145   : > { %1024 = vmatmul.bf16.vlgmr.msra.gmra.mxu2 %v847_v36  ;;  %1037 = vmatmul.bf16.vlgmr.msra.gmra.mxu3 %v847_v36 }
 0x146   : > { %1050 = vmatmul.bf16.vlgmr.msrb.gmra.mxu0 %v847_v36  ;;  %v829_v37 = vpop.f32.mrf.mxu0 }
 0x147   : > { %v842_v38 = vpop.f32.mrf.mxu1 }
 0x1c3   : > { %v1051_v41 = vpop.f32.mrf.mxu0 }
 0x1c4   : > { %v1052_v42 = vadd.f32 %v1051_v41, %v884_v40 }
 0x1c6   : > { %v4556_v45 = vpack.c.bf16 %v1052_v42, %v1052_v42 }
 0x1c8   : > { %v1025_v46 = vpop.f32.mrf.mxu2  ;;  %v1038_v47 = vpop.f32.mrf.mxu3  ;;  %v1098_v48 = vsel %vm1096_vm4, %v4556_v45, 0 }
 0x1c9   : > { %v1026_v49 = vadd.f32 %v1025_v46, %v882_v43  ;;  %v1039_v50 = vadd.f32 %v1038_v47, %v883_v44  ;;  %1107 = vmatpush.bf16.msrb.mxu2 %v1098_v48 }
 0x1cb   : > { %v1055_v51 = vpack.c.bf16 %v1026_v49, %v1026_v49  ;;  %v1056_v52 = vpack.c.bf16 %v1039_v50, %v1039_v50  ;;  %v1053_v53 = vpop.f32.mrf.mxu0 }
 0x1cd   : > { %1117 = vrot.lane.b32.xlu0 %v1056_v52, %s4322_s17  ;;  %1114 = vrot.lane.b32.xlu1 %v1055_v51, %s4322_s17  ;;  %v1063_v54 = vsel %vm1058_vm5, %v1056_v52, 0 }
 0x1ce   : > { %1072 = vmatpush.bf16.xpose.msrb.mxu1 %v1063_v54 }
 0x1d0   : > { %v1027_v55 = vpop.f32.mrf.mxu2  ;;  %v1040_v56 = vpop.f32.mrf.mxu3 }
 0x1d5   : > { %3125 = vmatmul.msk.bf16.vlgmr.msrb.gmra.mxu1 %vm1058_vm5, %v1055_v51 }
 0x23f   : > { %v1118_v57 = vpop.permute.xlu0 %1117  ;;  %v1115_v59 = vpop.permute.xlu1 %1114 }
 0x240   : > { %v1123_v58 = vsel %vm1058_vm5, %v1118_v57, 0 }
 0x241   : > { %1132 = vmatpush.bf16.xpose.msrb.mxu3 %v1123_v58 }
 0x248   : > { %3127 = vmatmul.msk.bf16.vlgmr.msrb.gmra.mxu3 %vm1058_vm5, %v1115_v59 }
 0x252   : > { %v1074_v62 = vpop.f32.mrf.mxu1 }
 0x253   : > { %v1078_v63 = vmul.f32 0.17677669, %v1074_v62 }
 0x255   : > { %v1079_v0 = vsel %vm4568_vm6, %v1078_v63, -1e+30 }
 0x256   : > { %v1081_v1 = vsel %vm1080_vm7, %v1079_v0, -inf }
 0x257   : > { %1082 = vmax.xlane.f32.xlu1 %v1081_v1 }
 0x25a   : > { %v1076_v3 = vpop.f32.mrf.mxu1 }
 0x270   : > { %1234 = vrot.lane.b32.xlu1 %v1056_v52, %s4323_s27 }
 0x278   : > { %1211 = vrot.lane.b32.xlu1 %v4556_v45, %s4324_s1 }
 0x2ca   : > { %v1083_v2 = vpop.xlane.xlu1 %1082 }
 0x2cb   : > { %v1084_v4 = vsub.f32 %v1079_v0, %v1083_v2  ;;  %v1134_v5 = vpop.f32.mrf.mxu3 }
 0x2cc   : > { %v1138_v6 = vmul.f32 0.17677669, %v1134_v5 }
 0x2cd   : > { %v1085_v7 = vmul.f32 1.442695, %v1084_v4 }
 0x2ce   : > { %v1139_v8 = vsel %vm4568_vm6, %v1138_v6, -1e+30 }
 0x2cf   : > { %3940 = vpow2.f32 %v1085_v7  ;;  %v1140_v9 = vsel %vm1080_vm7, %v1139_v8, -inf }
 0x2d0   : > { %1141 = vmax.xlane.f32.xlu2 %v1140_v9 }
 0x2d3   : > { %v1136_v10 = vpop.f32.mrf.mxu3 }
 0x2d5   : > { %v3941_v11 = vpop.eup %3940 }
 0x2d6   : > { %v1087_v12 = vsel %vm1080_vm7, %v3941_v11, 0.0 }
 0x2d8   : > { %1088 = vadd.xlane.f32.xlu2 %v1087_v12  ;;  %v3680_v12 = vld [vmem:[#allocation8 + $0x30] sm:$0xff] }
 0x2e2   : > { %v1235_v13 = vpop.permute.xlu1 %1234 }
 0x2e3   : > { %v1240_v29 = vsel %vm1058_vm5, %v1235_v13, 0  ;;  %v3678_v13 = vld [vmem:[#allocation8 + $0x20] sm:$0xff] }
 0x2ea   : > { %v1212_v14 = vpop.permute.xlu1 %1211 }
 0x2eb   : > { %v1217_v15 = vsel %vm1096_vm4, %v1212_v14, 0  ;;  %v3677_v14 = vld [vmem:[#allocation8 + $0x18] sm:$0xff] }
 0x2ec   : > { %1226 = vmatpush.bf16.msra.mxu3 %v1217_v15  ;;  %v3676_v15 = vld [vmem:[#allocation8 + $0x10] sm:$0xff] }
 0x2f0   : > { %1176 = vrot.lane.b32.xlu2 %v1056_v52, %s4324_s1 }
 0x2f8   : > { %1153 = vrot.lane.b32.xlu2 %v4556_v45, %s4322_s17 }
 0x300   : > { %1174 = vrot.lane.b32.xlu2 %v1055_v51, %s4324_s1 }
 0x308   : > { %1232 = vrot.lane.b32.xlu2 %v1055_v51, %s4323_s27 }
 0x343   : > { %v1142_v16 = vpop.xlane.xlu2 %1141 }
 0x344   : > { %v1143_v17 = vsub.f32 %v1139_v8, %v1142_v16  ;;  %v3675_v16 = vld [vmem:[#allocation8 + $0x8] sm:$0xff] }
 0x346   : > { %v1144_v18 = vmul.f32 1.442695, %v1143_v17 }
 0x348   : > { %3942 = vpow2.f32 %v1144_v18 }
 0x34b   : > { %v1089_v19 = vpop.xlane.xlu2 %1088 }
 0x34c   : > { %3944 = vrcp.f32 %v1089_v19  ;;  %v3674_v19 = vld [vmem:[#allocation8] sm:$0xff] }
 0x34e   : > { %v3943_v20 = vpop.eup %3942 }
 0x34f   : > { %v1146_v21 = vsel %vm1080_vm7, %v3943_v20, 0.0 }
 0x350   : > { %1147 = vadd.xlane.f32.xlu0 %v1146_v21 }
 0x352   : > { %v3945_v22 = vpop.eup %3944 }
 0x353   : > { %v1091_v23 = vmul.f32 %v3945_v22, %v3941_v11  ;;  %v1177_v24 = vpop.permute.xlu2 %1176  ;;  %v3681_v11 = vld [vmem:[#allocation8 + $0x38] sm:$0xff] }
 0x354   : > { %v1182_v25 = vsel %vm1058_vm5, %v1177_v24, 0 }
 0x355   : > { %1191 = vmatpush.bf16.xpose.msra.mxu2 %v1182_v25  ;;  %v1092_v26 = vpack.c.bf16 %v1091_v23, %v1091_v23 }
 0x357   : > { %3126 = vmatmul.msk.bf16.vlgmr.msrb.gmra.mxu2 %vm1080_vm7, %v1092_v26 }
 0x35b   : > { %v1154_v27 = vpop.permute.xlu2 %1153 }
 0x35c   : > { %v1159_v28 = vsel %vm1096_vm4, %v1154_v27, 0  ;;  %v3928_v27 = vld [vmem:[%s4790_s6] ss:$0 sm:$0xff] }
 0x35d   : > { %1168 = vmatpush.bf16.msra.mxu1 %v1159_v28  ;;  %1376 = vmatpush.bf16.msrb.mxu2 %v3681_v11  ;;  %v3183_v11 = vld [vmem:[#allocation10 + $0x20] sm:$0xf] }
 0x361   : > { %1249 = vmatpush.bf16.xpose.msrb.mxu1 %v1240_v29  ;;  %1377 = vmatpush.bf16.msrb.mxu2 %v3680_v12  ;;  %v3687_v12 = vld [vmem:[#allocation10 + $0x24] sm:$0xf0] }
 0x363   : > { %v1175_v30 = vpop.permute.xlu2 %1174 }
 0x367   : > { %3129 = vmatmul.msk.bf16.vlgmr.msra.gmra.mxu2 %vm1058_vm5, %v1175_v30 }
 0x36b   : > { %v1233_v37 = vpop.permute.xlu2 %1232 }
 0x3c3   : > { %v1148_v31 = vpop.xlane.xlu0 %1147 }
 0x3c4   : > { %3946 = vrcp.f32 %v1148_v31 }
 0x3ca   : > { %v3947_v32 = vpop.eup %3946 }
 0x3cb   : > { %v1150_v33 = vmul.f32 %v3947_v32, %v3943_v20  ;;  %v4325_v32 = vmov 128.0  }
 0x3cd   : > { %v1151_v34 = vpack.c.bf16 %v1150_v33, %v1150_v33  ;;  %v3223_v33 = vld [vmem:[#allocation10 + $0x70] sm:$0xf] }
 0x3cf   : > { %3128 = vmatmul.msk.bf16.vlgmr.msra.gmra.mxu1 %vm1080_vm7, %v1151_v34  ;;  %v3697_v34 = vld [vmem:[#allocation10 + $0x74] sm:$0xf0] }
 0x3da   : > { %v4595_v36 = vpop.f32.mrf.mxu2 }
 0x3df   : > { %3131 = vmatmul.msk.bf16.vlgmr.msrb.gmra.mxu1 %vm1058_vm5, %v1233_v37  ;;  %v3224_v37 = vor.u32 %v3697_v34, %v3223_v33  ;;  %v3704_v33 = vld [vmem:[#allocation11 + $0x30] sm:$0xff] }
 0x3e1   : > { %1530 = vmatpush.bf16.msrb.mxu3 %v3224_v37  ;;  %v3703_v37 = vld [vmem:[#allocation11 + $0x28] sm:$0xff] }
 0x3e2   : > { %v1111_v38 = vpop.f32.mrf.mxu2 }
 0x3e3   : > { %v3225_v38 = vld [vmem:[#allocation10 + $0x78] sm:$0xf0] }
 0x3ea   : > { %v1193_v39 = vpop.f32.mrf.mxu2 }
 0x3eb   : > { %v1197_v40 = vmul.f32 0.17677669, %v1193_v39 }
 0x3ed   : > { %v1198_v41 = vsel %vm4568_vm6, %v1197_v40, -1e+30 }
 0x3ee   : > { %v1199_v42 = vsel %vm1080_vm7, %v1198_v41, -inf }
 0x3ef   : > { %1200 = vmax.xlane.f32.xlu0 %v1199_v42 }
 0x3f2   : > { %v1195_v43 = vpop.f32.mrf.mxu2 }
 0x44c   : > { %v1170_v44 = vpop.f32.mrf.mxu1 }
 0x44d   : > { %1291 = vrot.lane.b32.xlu1 %v1170_v44, %s4323_s27 }
 0x454   : > { %v1172_v46 = vpop.f32.mrf.mxu1 }
 0x45c   : > { %v1251_v47 = vpop.f32.mrf.mxu1 }
 0x45d   : > { %v1255_v48 = vmul.f32 0.17677669, %v1251_v47 }
 0x45f   : > { %v1256_v49 = vsel %vm4568_vm6, %v1255_v48, -1e+30 }
 0x460   : > { %v1257_v50 = vsel %vm1080_vm7, %v1256_v49, -inf }
 0x461   : > { %1258 = vmax.xlane.f32.xlu2 %v1257_v50  ;;  %v3215_v50 = vld [vmem:[#allocation10 + $0x60] sm:$0xf] }
 0x462   : > { %v1201_v51 = vpop.xlane.xlu0 %1200 }
 0x463   : > { %v1202_v52 = vsub.f32 %v1198_v41, %v1201_v51  ;;  %v3695_v51 = vld [vmem:[#allocation10 + $0x64] sm:$0xf0] }
 0x464   : > { %v1253_v53 = vpop.f32.mrf.mxu1 }
 0x465   : > { %v1203_v54 = vmul.f32 1.442695, %v1202_v52  ;;  %v3694_v52 = vld [vmem:[#allocation10 + $0x64] sm:$0xf]  ;;  %v3216_v53 = vor.u32 %v3695_v51, %v3215_v50  ;;  %v3929_v51 = vld [vmem:[%s4791_s7] ss:$0 sm:$0xff] }
 0x467   : > { %3948 = vpow2.f32 %v1203_v54  ;;  %v3217_v54 = vld [vmem:[#allocation10 + $0x68] sm:$0xf0]  ;;  %1531 = vmatpush.bf16.msrb.mxu3 %v3216_v53 }
 0x46d   : > { %v3949_v55 = vpop.eup %3948 }
 0x46e   : > { %v1205_v56 = vsel %vm1080_vm7, %v3949_v55, 0.0 }
 0x46f   : > { %1206 = vadd.xlane.f32.xlu0 %v1205_v56  ;;  %v3207_v56 = vld [vmem:[#allocation10 + $0x50] sm:$0xf] }
 0x4bf   : > { %v1292_v20 = vpop.permute.xlu1 %1291 }
 0x4c0   : > { %v1302_v22 = vsel %vm1058_vm5, %v4595_v36, %v1292_v20  ;;  %v3696_v36 = vld [vmem:[#allocation10 + $0x74] sm:$0xf]  ;;  %v3177_v20 = vld [vmem:[#allocation10 + $0x18] sm:$0xf0] }
 0x4c1   : > { %v3228_v39 = vor.u32 %v3696_v36, %v3225_v38  ;;  %v3711_v36 = vld [vmem:[#allocation11 + $0x68] sm:$0xff]  ;;  %v3710_v38 = vld [vmem:[#allocation11 + $0x60] sm:$0xff] }
 0x4c3   : > { %1543 = vmatpush.bf16.msra.mxu0 %v3228_v39  ;;  %v3702_v39 = vld [vmem:[#allocation11 + $0x20] sm:$0xff] }
 0x4d4   : > { %v1259_v57 = vpop.xlane.xlu2 %1258 }
 0x4d5   : > { %v1260_v58 = vsub.f32 %v1256_v49, %v1259_v57  ;;  %v3693_v57 = vld [vmem:[#allocation10 + $0x54] sm:$0xf0] }
 0x4d7   : > { %v1261_v59 = vmul.f32 1.442695, %v1260_v58  ;;  %v3692_v58 = vld [vmem:[#allocation10 + $0x54] sm:$0xf] }
 0x4d9   : > { %3950 = vpow2.f32 %v1261_v59  ;;  %v3208_v59 = vor.u32 %v3693_v57, %v3207_v56 }
 0x4db   : > { %1532 = vmatpush.bf16.msrb.mxu3 %v3208_v59  ;;  %v3700_v59 = vld [vmem:[#allocation11 + $0x10] sm:$0xff] }
 0x4df   : > { %v3951_v60 = vpop.eup %3950 }
 0x4e0   : > { %v1263_v62 = vsel %vm1080_vm7, %v3951_v60, 0.0 }
 0x4e1   : > { %1264 = vadd.xlane.f32.xlu0 %v1263_v62 }
 0x4e2   : > { %v1207_v63 = vpop.xlane.xlu0 %1206 }
 0x4e3   : > { %3952 = vrcp.f32 %v1207_v63  ;;  %v3199_v63 = vld [vmem:[#allocation10 + $0x40] sm:$0xf] }
 0x4e9   : > { %v3953_v0 = vpop.eup %3952 }
 0x4ea   : > { %v1209_v1 = vmul.f32 %v3953_v0, %v3949_v55  ;;  %v3220_v55 = vor.u32 %v3694_v52, %v3217_v54  ;;  %v3691_v0 = vld [vmem:[#allocation10 + $0x44] sm:$0xf0]  ;;  %v3930_v54 = vld [vmem:[%s4792_s8] ss:$0 sm:$0xff] }
 0x4ec   : > { %v1210_v3 = vpack.c.bf16 %v1209_v1, %v1209_v1  ;;  %1544 = vmatpush.bf16.msra.mxu0 %v3220_v55  ;;  %v3690_v1 = vld [vmem:[#allocation10 + $0x44] sm:$0xf] }
 0x4ee   : > { %3130 = vmatmul.msk.bf16.vlgmr.msra.gmra.mxu3 %vm1080_vm7, %v1210_v3  ;;  %v3200_v3 = vor.u32 %v3691_v0, %v3199_v63  ;;  %v3698_v63 = vld [vmem:[#allocation11] sm:$0xff] }
 0x4f0   : > { %1533 = vmatpush.bf16.msrb.mxu3 %v3200_v3 }
 0x4f5   : > { %1269 = vrot.lane.b32.xlu0 %v4556_v45, %s4323_s27  ;;  %v3679_v45 = vld [vmem:[#allocation8 + $0x28] sm:$0xff] }
 0x4f6   : > { %1378 = vmatpush.bf16.msrb.mxu2 %v3679_v45  ;;  %v3686_v45 = vld [vmem:[#allocation10 + $0x24] sm:$0xf] }
 0x4fa   : > { %1379 = vmatpush.bf16.msrb.mxu2 %v3678_v13  ;;  %v3184_v13 = vor.u32 %v3687_v12, %v3183_v11  ;;  %v3931_v12 = vld [vmem:[%s4796_s12] ss:$0 sm:$0xff] }
 0x4fe   : > { %1380 = vmatpush.bf16.msrb.mxu2 %v3677_v14  ;;  %v3185_v14 = vld [vmem:[#allocation10 + $0x28] sm:$0xf0] }
 0x502   : > { %1381 = vmatpush.bf16.msrb.mxu2 %v3676_v15  ;;  %v3188_v15 = vor.u32 %v3686_v45, %v3185_v14 }
 0x506   : > { %1382 = vmatpush.bf16.msrb.mxu2 %v3675_v16  ;;  %v3175_v16 = vld [vmem:[#allocation10 + $0x10] sm:$0xf] }
 0x50a   : > { %1383 = vmatpush.bf16.msrb.mxu2 %v3674_v19 }
 0x554   : > { %v1265_v2 = vpop.xlane.xlu0 %1264 }
 0x555   : > { %3954 = vrcp.f32 %v1265_v2  ;;  %v3201_v2 = vld [vmem:[#allocation10 + $0x48] sm:$0xf0] }
 0x556   : > { %3956 = vrcp.f32 %v4325_v32  ;;  %v3712_v32 = vld [vmem:[#allocation11 + $0x70] sm:$0xff] }
 0x55b   : > { %v3955_v4 = vpop.eup %3954 }
 0x55c   : > { %v1267_v5 = vmul.f32 %v3955_v4, %v3951_v60  ;;  %v3957_v40 = vpop.eup %3956  ;;  %v3209_v60 = vld [vmem:[#allocation10 + $0x58] sm:$0xf0]  ;;  %v3204_v4 = vor.u32 %v3690_v1, %v3201_v2 }
 0x55d   : > { %v1395_v41 = vmul.f32 128.0, %v3957_v40  ;;  %vm1399_vm10 = vweird.f32 %v3957_v40  ;;  %v3212_v62 = vor.u32 %v3692_v58, %v3209_v60  ;;  %v3707_v58 = vld [vmem:[#allocation11 + $0x48] sm:$0xff]  ;;  %v3706_v60 = vld [vmem:[#allocation11 + $0x40] sm:$0xff] }
 0x55e   : > { %v1268_v8 = vpack.c.bf16 %v1267_v5, %v1267_v5  ;;  %v3191_v5 = vld [vmem:[#allocation10 + $0x30] sm:$0xf] }
 0x55f   : > { %v1396_v42 = vsub.f32 1.0, %v1395_v41  ;;  %1545 = vmatpush.bf16.msra.mxu0 %v3212_v62  ;;  %v3699_v62 = vld [vmem:[#allocation11 + $0x8] sm:$0xff] }
 0x561   : > { %v1397_v43 = vmul.f32 %v3957_v40, %v1396_v42  ;;  %v3709_v42 = vld [vmem:[#allocation11 + $0x58] sm:$0xff] }
 0x563   : > { %v1398_v44 = vadd.f32 %v3957_v40, %v1397_v43  ;;  %1546 = vmatpush.bf16.msra.mxu0 %v3204_v4  ;;  %v3701_v43 = vld [vmem:[#allocation11 + $0x18] sm:$0xff] }
 0x565   : > { %v4622_v46 = vsel %vm1399_vm10, %v3957_v40, %v1398_v44 }
 0x567   : > { %v1270_v6 = vpop.permute.xlu0 %1269 }
 0x568   : > { %v1275_v7 = vsel %vm1096_vm4, %v1270_v6, 0  ;;  %v3689_v6 = vld [vmem:[#allocation10 + $0x34] sm:$0xf0] }
 0x569   : > { %1284 = vmatpush.bf16.msra.mxu1 %v1275_v7  ;;  %v3688_v7 = vld [vmem:[#allocation10 + $0x34] sm:$0xf] }
 0x56c   : > { %3132 = vmatmul.msk.bf16.vlgmr.msra.gmra.mxu1 %vm1080_vm7, %v1268_v8  ;;  %v3192_v8 = vor.u32 %v3689_v6, %v3191_v5 }
 0x56e   : > { %1534 = vmatpush.bf16.msrb.mxu3 %v3192_v8 }
 0x571   : > { %v1228_v9 = vpop.f32.mrf.mxu3 }
 0x572   : > { %1295 = vrot.lane.b32.xlu1 %v1228_v9, %s4324_s1  ;;  %v3193_v9 = vld [vmem:[#allocation10 + $0x38] sm:$0xf0]  ;;  %1535 = vmatpush.bf16.msrb.mxu3 %v3184_v13 }
 0x579   : > { %v1230_v10 = vpop.f32.mrf.mxu3 }
 0x57a   : > { %v3196_v10 = vor.u32 %v3688_v7, %v3193_v9 }
 0x57c   : > { %1547 = vmatpush.bf16.msra.mxu0 %v3196_v10 }
 0x580   : > { %1548 = vmatpush.bf16.msra.mxu0 %v3188_v15 }
 0x5e4   : > { %v1296_v21 = vpop.permute.xlu1 %1295 }
 0x5e5   : > { %v1304_v23 = vsel %vm1303_vm8, %v1302_v22, %v1296_v21  ;;  %v3167_v21 = vld [vmem:[#allocation10] sm:$0xf]  ;;  %v3683_v22 = vld [vmem:[#allocation10 + $0x4] sm:$0xf0] }
 0x5e9   : > { %v1286_v17 = vpop.f32.mrf.mxu1 }
 0x5ea   : > { %1299 = vrot.lane.b32.xlu1 %v1286_v17, %s4322_s17  ;;  %v3685_v17 = vld [vmem:[#allocation10 + $0x14] sm:$0xf0] }
 0x5eb   : > { %v3176_v19 = vor.u32 %v3685_v17, %v3175_v16 }
 0x5ed   : > { %1536 = vmatpush.bf16.msrb.mxu3 %v3176_v19  ;;  %v3380_v19 = vld [vmem:[#allocation7 + $0x168] sm:$0xf] }
 0x5f1   : > { %v1288_v18 = vpop.f32.mrf.mxu1 }
 0x5f2   : > { %v3684_v18 = vld [vmem:[#allocation10 + $0x14] sm:$0xf] }
 0x65c   : > { %v1300_v24 = vpop.permute.xlu1 %1299 }
 0x65d   : > { %v1306_v25 = vsel %vm1305_vm9, %v1304_v23, %v1300_v24  ;;  %v3180_v23 = vor.u32 %v3684_v18, %v3177_v20  ;;  %v3682_v24 = vld [vmem:[#allocation10 + $0x4] sm:$0xf]  ;;  %v3736_v20 = vld [vmem:[#allocation7 + $0x170] sm:$0xf0] }
 0x65e   : > { %v1307_v26 = vpack.c.bf16 %v1306_v25, %v1306_v25  ;;  %v3169_v25 = vld [vmem:[#allocation10 + $0x8] sm:$0xf0] }
 0x65f   : > { %1549 = vmatpush.bf16.msra.mxu0 %v3180_v23  ;;  %v3382_v23 = vld [vmem:[#allocation7 + $0x174] sm:$0xf0] }
 0x660   : > { %1384 = vmatmul.bf16.vlgmr.msrb.gmra.mxu2 %v1307_v26  ;;  %v3168_v26 = vor.u32 %v3683_v22, %v3167_v21  ;;  %v3735_v21 = vld [vmem:[#allocation7 + $0x16c] sm:$0xf]  ;;  %v3381_v22 = vor.u32 %v3736_v20, %v3380_v19  ;;  %v3310_v19 = vld [vmem:[#allocation7 + $0xe4] sm:$0xf0]  ;;  %v3316_v20 = vld [vmem:[#allocation7 + $0xe0] sm:$0xf] }
 0x662   : > { %1537 = vmatpush.bf16.msrb.mxu3 %v3168_v26  ;;  %v3385_v26 = vor.u32 %v3735_v21, %v3382_v23  ;;  %v3719_v21 = vld [vmem:[#allocation7 + $0xe8] sm:$0xf0] }
 0x663   : > { %v3317_v23 = vor.u32 %v3719_v21, %v3316_v20 }
 0x666   : > { %1920 = vmatpush.bf16.msra.mxu3 %v3381_v22 }
 0x6e3   : > { %v1385_v28 = vpop.f32.mrf.mxu2 }
 0x6e4   : > { %v1386_v29 = vadd.f32 %v3928_v27, %v1385_v28  ;;  %v3172_v27 = vor.u32 %v3682_v24, %v3169_v25  ;;  %v3713_v28 = vld [vmem:[#allocation11 + $0x78] sm:$0xff]  ;;  %v3388_v24 = vld [vmem:[#allocation7 + $0x170] sm:$0xf] }
 0x6e5   : > { %1705 = vmatpush.bf16.msra.mxu2 %v3713_v28  ;;  %v3737_v25 = vld [vmem:[#allocation7 + $0x178] sm:$0xf0] }
 0x6e6   : > { %v1389_v30 = vadd.f32 %v1386_v29, %v4549_v35  ;;  %1550 = vmatpush.bf16.msra.mxu0 %v3172_v27  ;;  %v3705_v29 = vld [vmem:[#allocation11 + $0x38] sm:$0xff]  ;;  %v3389_v27 = vor.u32 %v3737_v25, %v3388_v24  ;;  %v3296_v24 = vld [vmem:[#allocation7 + $0xc0] sm:$0xf]  ;;  %v3715_v25 = vld [vmem:[#allocation7 + $0xc8] sm:$0xf0] }
 0x6e7   : > { %1692 = vmatpush.bf16.msrb.mxu1 %v3705_v29 }
 0x6e8   : > { %1392 = vadd.xlane.f32.xlu0 %v1389_v30 }
 0x6e9   : > { %1706 = vmatpush.bf16.msra.mxu2 %v3712_v32  ;;  %v3368_v32 = vld [vmem:[#allocation7 + $0x150] sm:$0xf] }
 0x6ea   : > { %1933 = vmatpush.bf16.msrb.mxu0 %v3385_v26  ;;  %v3714_v26 = vld [vmem:[#allocation7 + $0xc4] sm:$0xf] }
 0x6eb   : > { %v1387_v31 = vpop.f32.mrf.mxu2  ;;  %1693 = vmatpush.bf16.msrb.mxu1 %v3704_v33  ;;  %v3733_v33 = vld [vmem:[#allocation7 + $0x158] sm:$0xf0] }
 0x6ed   : > { %1707 = vmatpush.bf16.msra.mxu2 %v3711_v36  ;;  %v3369_v36 = vor.u32 %v3733_v33, %v3368_v32 }
 0x6ef   : > { %1694 = vmatpush.bf16.msrb.mxu1 %v3703_v37  ;;  %v3370_v37 = vld [vmem:[#allocation7 + $0x15c] sm:$0xf0]  ;;  %1921 = vmatpush.bf16.msra.mxu3 %v3369_v36 }
 0x6f1   : > { %1708 = vmatpush.bf16.msra.mxu2 %v3710_v38  ;;  %v3376_v38 = vld [vmem:[#allocation7 + $0x158] sm:$0xf] }
 0x6f3   : > { %1695 = vmatpush.bf16.msrb.mxu1 %v3702_v39  ;;  %v3734_v39 = vld [vmem:[#allocation7 + $0x160] sm:$0xf0] }
 0x6f5   : > { %1709 = vmatpush.bf16.msra.mxu2 %v3709_v42  ;;  %v3356_v42 = vld [vmem:[#allocation7 + $0x138] sm:$0xf] }
 0x6f7   : > { %1696 = vmatpush.bf16.msrb.mxu1 %v3701_v43  ;;  %v3730_v43 = vld [vmem:[#allocation7 + $0x140] sm:$0xf0] }
 0x6fb   : > { %1697 = vmatpush.bf16.msrb.mxu1 %v3700_v59  ;;  %v3728_v59 = vld [vmem:[#allocation7 + $0x130] sm:$0xf0] }
 0x6ff   : > { %1698 = vmatpush.bf16.msrb.mxu1 %v3699_v62 }
 0x703   : > { %1699 = vmatpush.bf16.msrb.mxu1 %v3698_v63  ;;  %v3332_v63 = vld [vmem:[#allocation7 + $0x108] sm:$0xf] }
 0x707   : > { %1946 = vmatpush.bf16.msra.mxu1 %v3389_v27  ;;  %v3297_v27 = vor.u32 %v3715_v25, %v3296_v24 }
 0x75b   : > { %v1393_v35 = vpop.xlane.xlu0 %1392 }
 0x75c   : > { %v1401_v47 = vmul.f32 %v4622_v46, %v1393_v35 }
 0x75e   : > { %v4625_v48 = vsub.f32 %v1389_v30, %v1401_v47  ;;  %v3708_v47 = vld [vmem:[#allocation11 + $0x50] sm:$0xff] }
 0x75f   : > { %1710 = vmatpush.bf16.msra.mxu2 %v3708_v47  ;;  %v3358_v47 = vld [vmem:[#allocation7 + $0x144] sm:$0xf0] }
 0x760   : > { %v1403_v49 = vmul.f32 %v4625_v48, %v4625_v48 }
 0x762   : > { %1404 = vadd.xlane.f32.xlu2 %v1403_v49 }
 0x763   : > { %1711 = vmatpush.bf16.msra.mxu2 %v3707_v58  ;;  %v3352_v58 = vld [vmem:[#allocation7 + $0x128] sm:$0xf] }
 0x764   : > { %v3353_v62 = vor.u32 %v3728_v59, %v3352_v58 }
 0x767   : > { %1712 = vmatpush.bf16.msra.mxu2 %v3706_v60 }
 0x7d5   : > { %v1405_v30 = vpop.xlane.xlu2 %1404 }
 0x7d6   : > { %v1406_v31 = vmul.f32 %v1405_v30, %v4622_v46 }
 0x7d8   : > { %v1407_v34 = vadd.f32 1e-05, %v1406_v31 }
 0x7da   : > { %3958 = vrsqrt.f32 %v1407_v34  ;;  %vm1414_vm12 = vweird.f32 %v1407_v34 }
 0x7e0   : > { %v3959_v40 = vpop.eup %3958 }
 0x7e1   : > { %v1409_v41 = vmul.f32 %v3959_v40, %v1407_v34  ;;  %vm1415_vm11 = vweird.f32 %v3959_v40  ;;  %v3732_v34 = vld [vmem:[#allocation7 + $0x154] sm:$0xf] }
 0x7e2   : > { %vm1416_vm13 = vmor %vm1414_vm12, %vm1415_vm11 }
 0x7e3   : > { %v1410_v44 = vmul.f32 %v3959_v40, %v1409_v41  ;;  %v3377_v41 = vor.u32 %v3734_v39, %v3376_v38 }
 0x7e5   : > { %v1411_v35 = vmul.f32 0.5, %v1410_v44  ;;  %1947 = vmatpush.bf16.msra.mxu1 %v3377_v41  ;;  %v3729_v44 = vld [vmem:[#allocation7 + $0x13c] sm:$0xf] }
 0x7e7   : > { %v1412_v49 = vsub.f32 1.5, %v1411_v35  ;;  %v3357_v35 = vor.u32 %v3730_v43, %v3356_v42 }
 0x7e9   : > { %v1413_v50 = vmul.f32 %v3959_v40, %v1412_v49  ;;  %v3364_v49 = vld [vmem:[#allocation7 + $0x140] sm:$0xf]  ;;  %1922 = vmatpush.bf16.msra.mxu3 %v3357_v35 }
 0x7eb   : > { %v1417_v52 = vsel %vm1416_vm13, %v3959_v40, %v1413_v50  ;;  %v3373_v40 = vor.u32 %v3732_v34, %v3370_v37  ;;  %v3731_v50 = vld [vmem:[#allocation7 + $0x148] sm:$0xf0] }
 0x7ec   : > { %v1418_v53 = vmul.f32 %v1417_v52, %v4625_v48  ;;  %v1444_v48 = vld [vmem:[%s4794_s10] sm:$0x3]  ;;  %v3365_v52 = vor.u32 %v3731_v50, %v3364_v49 }
 0x7ed   : > { %v1447_v0 = vperm.slane %v1444_v48, 1  ;;  %v1446_v4 = vperm.slane %v1444_v48, 0  ;;  %1934 = vmatpush.bf16.msrb.mxu0 %v3373_v40  ;;  %v3724_v48 = vld [vmem:[#allocation7 + $0x110] sm:$0xf0]  ;;  %v3933_v49 = vld [vmem:[%s4837_s22] ss:$0 sm:$0xff] }
 0x7ee   : > { %v1422_v55 = vmul.f32 %v3929_v51, %v1418_v53  ;;  %v3361_v51 = vor.u32 %v3729_v44, %v3358_v47  ;;  %1948 = vmatpush.bf16.msra.mxu1 %v3365_v52  ;;  %v3344_v53 = vld [vmem:[#allocation7 + $0x120] sm:$0xf]  ;;  %v3932_v44 = vld [vmem:[%s4797_s13] ss:$0 sm:$0xff] }
 0x7f0   : > { %v1426_v56 = vadd.f32 %v3930_v54, %v1422_v55  ;;  %v3727_v54 = vld [vmem:[#allocation7 + $0x128] sm:$0xf0]  ;;  %v3726_v55 = vld [vmem:[#allocation7 + $0x124] sm:$0xf] }
 0x7f1   : > { %1935 = vmatpush.bf16.msrb.mxu0 %v3361_v51 }
 0x7f2   : > { %v1427_v57 = vpack.c.bf16 %v1426_v56, %v1426_v56  ;;  %1949 = vmatpush.bf16.msra.mxu1 %v3353_v62 }
 0x7f4   : > { %1538 = vmatmul.bf16.vlgmr.msrb.gmra.mxu3 %v1427_v57  ;;  %1551 = vmatmul.bf16.vlgmr.msra.gmra.mxu0 %v1427_v57  ;;  %v3346_v57 = vld [vmem:[#allocation7 + $0x12c] sm:$0xf0] }
 0x7f5   : > { %v3349_v60 = vor.u32 %v3726_v55, %v3346_v57 }
 0x7f7   : > { %1936 = vmatpush.bf16.msrb.mxu0 %v3349_v60 }
 0x871   : > { %v1552_v1 = vpop.f32.mrf.mxu0 }
 0x872   : > { %v1553_v3 = vadd.f32 %v1552_v1, %v1447_v0  ;;  %v3723_v0 = vld [vmem:[#allocation7 + $0x10c] sm:$0xf]  ;;  %v3333_v1 = vor.u32 %v3724_v48, %v3332_v63 }
 0x874   : > { %v1557_v2 = vmax.f32 %v1553_v3, 0.0  ;;  %v3334_v3 = vld [vmem:[#allocation7 + $0x114] sm:$0xf0] }
 0x876   : > { %v1559_v5 = vpack.c.bf16 %v1557_v2, %v1557_v2  ;;  %v3340_v2 = vld [vmem:[#allocation7 + $0x110] sm:$0xf] }
 0x877   : > { %v1539_v6 = vpop.f32.mrf.mxu3 }
 0x878   : > { %v1540_v7 = vadd.f32 %v1539_v6, %v1446_v4  ;;  %1713 = vmatmul.bf16.vlgmr.msra.gmra.mxu2 %v1559_v5  ;;  %v3725_v4 = vld [vmem:[#allocation7 + $0x118] sm:$0xf0]  ;;  %v3337_v5 = vor.u32 %v3723_v0, %v3334_v3 }
 0x879   : > { %v1554_v8 = vpop.f32.mrf.mxu0  ;;  %v3341_v6 = vor.u32 %v3725_v4, %v3340_v2 }
 0x87a   : > { %v1556_v9 = vmax.f32 %v1540_v7, 0.0  ;;  %1937 = vmatpush.bf16.msrb.mxu0 %v3337_v5  ;;  %v3320_v7 = vld [vmem:[#allocation7 + $0xf0] sm:$0xf]  ;;  %v3721_v8 = vld [vmem:[#allocation7 + $0xf8] sm:$0xf0] }
 0x87b   : > { %1950 = vmatpush.bf16.msra.mxu1 %v3341_v6 }
 0x87c   : > { %v1558_v10 = vpack.c.bf16 %v1556_v9, %v1556_v9  ;;  %v3720_v9 = vld [vmem:[#allocation7 + $0xf4] sm:$0xf] }
 0x87e   : > { %1700 = vmatmul.bf16.vlgmr.msrb.gmra.mxu1 %v1558_v10  ;;  %v3321_v10 = vor.u32 %v3721_v8, %v3320_v7 }
 0x87f   : > { %v1541_v11 = vpop.f32.mrf.mxu3 }
 0x880   : > { %v3322_v11 = vld [vmem:[#allocation7 + $0xfc] sm:$0xf0] }
 0x8fb   : > { %v1701_v45 = vpop.f32.mrf.mxu1  ;;  %v1714_v13 = vpop.f32.mrf.mxu2 }
 0x8fc   : > { %v1702_v14 = vadd.f32 %v3931_v12, %v1701_v45  ;;  %v3328_v12 = vld [vmem:[#allocation7 + $0xf8] sm:$0xf]  ;;  %v3722_v45 = vld [vmem:[#allocation7 + $0x100] sm:$0xf0] }
 0x8fe   : > { %v1715_v15 = vadd.f32 %v1714_v13, %v1702_v14  ;;  %v3325_v13 = vor.u32 %v3720_v9, %v3322_v11  ;;  %v3329_v14 = vor.u32 %v3722_v45, %v3328_v12 }
 0x900   : > { %v1718_v16 = vadd.f32 %v1715_v15, %v1426_v56  ;;  %v3345_v56 = vor.u32 %v3727_v54, %v3344_v53  ;;  %1938 = vmatpush.bf16.msrb.mxu0 %v3325_v13  ;;  %1951 = vmatpush.bf16.msra.mxu1 %v3329_v14  ;;  %v3308_v15 = vld [vmem:[#allocation7 + $0xd8] sm:$0xf] }
 0x901   : > { %v3293_v53 = vld [vmem:[%s4788_s4 + $0x3] sm:$0x7] }
 0x902   : > { %1721 = vadd.xlane.f32.xlu1 %v1718_v16  ;;  %1923 = vmatpush.bf16.msra.mxu3 %v3345_v56  ;;  %v1787_v54 = vperm.slane %v3293_v53, 1  ;;  %v1788_v55 = vperm.slane %v3293_v53, 2  ;;  %v1786_v60 = vperm.slane %v3293_v53, 0 }
 0x903   : > { %v1703_v17 = vpop.f32.mrf.mxu1  ;;  %v1716_v18 = vpop.f32.mrf.mxu2 }
 0x904   : > { %v3717_v17 = vld [vmem:[#allocation7 + $0xdc] sm:$0xf]  ;;  %1952 = vmatpush.bf16.msra.mxu1 %v3317_v23 }
 0x905   : > { %v3313_v22 = vor.u32 %v3717_v17, %v3310_v19 }
 0x906   : > { %1924 = vmatpush.bf16.msra.mxu3 %v3333_v1 }
 0x907   : > { %1939 = vmatpush.bf16.msrb.mxu0 %v3313_v22 }
 0x90a   : > { %1925 = vmatpush.bf16.msra.mxu3 %v3321_v10 }
 0x975   : > { %v1722_v28 = vpop.xlane.xlu1 %1721 }
 0x976   : > { %v1723_v29 = vmul.f32 %v1722_v28, %v4622_v46  ;;  %v3298_v28 = vld [vmem:[#allocation7 + $0xcc] sm:$0xf0] }
 0x977   : > { %v3301_v32 = vor.u32 %v3714_v26, %v3298_v28 }
 0x978   : > { %v4644_v30 = vsub.f32 %v1718_v16, %v1723_v29  ;;  %v3718_v16 = vld [vmem:[#allocation7 + $0xe0] sm:$0xf0]  ;;  %v3304_v29 = vld [vmem:[#allocation7 + $0xc8] sm:$0xf] }
 0x979   : > { %v3309_v18 = vor.u32 %v3718_v16, %v3308_v15  ;;  %1940 = vmatpush.bf16.msrb.mxu0 %v3301_v32 }
 0x97a   : > { %v1725_v31 = vmul.f32 %v4644_v30, %v4644_v30 }
 0x97b   : > { %1926 = vmatpush.bf16.msra.mxu3 %v3309_v18 }
 0x97c   : > { %1726 = vadd.xlane.f32.xlu2 %v1725_v31  ;;  %v3716_v31 = vld [vmem:[#allocation7 + $0xd0] sm:$0xf0] }
 0x97d   : > { %v3305_v33 = vor.u32 %v3716_v31, %v3304_v29 }
 0x97f   : > { %1927 = vmatpush.bf16.msra.mxu3 %v3297_v27  ;;  %1953 = vmatpush.bf16.msra.mxu1 %v3305_v33 }
 0x9ef   : > { %v1727_v34 = vpop.xlane.xlu2 %1726 }
 0x9f0   : > { %v1728_v36 = vmul.f32 %v1727_v34, %v4622_v46 }
 0x9f2   : > { %v1729_v37 = vadd.f32 1e-05, %v1728_v36 }
 0x9f4   : > { %3960 = vrsqrt.f32 %v1729_v37  ;;  %vm1736_vm15 = vweird.f32 %v1729_v37 }
 0x9fa   : > { %v3961_v38 = vpop.eup %3960 }
 0x9fb   : > { %v1731_v39 = vmul.f32 %v3961_v38, %v1729_v37  ;;  %vm1737_vm14 = vweird.f32 %v3961_v38 }
 0x9fc   : > { %vm1738_vm0 = vmor %vm1736_vm15, %vm1737_vm14 }
 0x9fd   : > { %v1732_v40 = vmul.f32 %v3961_v38, %v1731_v39 }
 0x9ff   : > { %v1733_v41 = vmul.f32 0.5, %v1732_v40 }
 0xa01   : > { %v1734_v42 = vsub.f32 1.5, %v1733_v41 }
 0xa03   : > { %v1735_v43 = vmul.f32 %v3961_v38, %v1734_v42 }
 0xa05   : > { %v1739_v35 = vsel %vm1738_vm0, %v3961_v38, %v1735_v43 }
 0xa06   : > { %v1740_v47 = vmul.f32 %v1739_v35, %v4644_v30 }
 0xa08   : > { %v1744_v50 = vmul.f32 %v3932_v44, %v1740_v47 }
 0xa0a   : > { %v4656_v51 = vadd.f32 %v3933_v49, %v1744_v50 }
 0xa0c   : > { %v1749_v52 = vpack.c.bf16 %v4656_v51, %v4656_v51 }
 0xa0e   : > { %1928 = vmatmul.bf16.vlgmr.msra.gmra.mxu3 %v1749_v52  ;;  %1941 = vmatmul.bf16.vlgmr.msrb.gmra.mxu0 %v1749_v52 }
 0xa0f   : > { %1954 = vmatmul.bf16.vlgmr.msra.gmra.mxu1 %v1749_v52 }
 0xa8b   : > { %v1942_v30 = vpop.f32.mrf.mxu0 }
 0xa8c   : > { %v1943_v56 = vadd.f32 %v1942_v30, %v1787_v54  ;;  %v1955_v57 = vpop.f32.mrf.mxu1 }
 0xa8d   : > { %v1956_v58 = vadd.f32 %v1955_v57, %v1788_v55 }
 0xa8e   : > { %v1960_v59 = vpack.c.bf16 %v1943_v56, %v1943_v56 }
 0xa8f   : > { %v4663_v62 = vpack.c.bf16 %v1956_v58, %v1956_v58 }
 0xa90   : > { %2077 = vrot.lane.b32.xlu0 %v1960_v59, %s4324_s1  ;;  %2018 = vrot.lane.b32.xlu2 %v1960_v59, %s4322_s17  ;;  %v1966_v63 = vsel %vm1058_vm5, %v1960_v59, 0 }
 0xa91   : > { %v1929_v48 = vpop.f32.mrf.mxu3  ;;  %1975 = vmatpush.bf16.xpose.msrb.mxu2 %v1966_v63  ;;  %v1999_v0 = vsel %vm1096_vm4, %v4663_v62, 0 }
 0xa92   : > { %v1930_v1 = vadd.f32 %v1929_v48, %v1786_v60  ;;  %2008 = vmatpush.bf16.msrb.mxu3 %v1999_v0 }
 0xa93   : > { %v1944_v3 = vpop.f32.mrf.mxu0 }
 0xa94   : > { %v1959_v2 = vpack.c.bf16 %v1930_v1, %v1930_v1  ;;  %v1957_v4 = vpop.f32.mrf.mxu1 }
 0xa96   : > { %2075 = vrot.lane.b32.xlu1 %v1959_v2, %s4324_s1 }
 0xa98   : > { %2015 = vrot.lane.b32.xlu2 %v1959_v2, %s4322_s17  ;;  %3390 = vmatmul.msk.bf16.vlgmr.msrb.gmra.mxu2 %vm1058_vm5, %v1959_v2 }
 0xa99   : > { %v1931_v5 = vpop.f32.mrf.mxu3 }
 0xaa0   : > { %2135 = vrot.lane.b32.xlu2 %v1960_v59, %s4323_s27 }
 0xaa8   : > { %2133 = vrot.lane.b32.xlu2 %v1959_v2, %s4323_s27 }
 0xaea   : > { %v2019_v6 = vpop.permute.xlu2 %2018 }
 0xaeb   : > { %v2024_v7 = vsel %vm1058_vm5, %v2019_v6, 0 }
 0xaec   : > { %2033 = vmatpush.bf16.xpose.msra.mxu0 %v2024_v7 }
 0xaf2   : > { %v2016_v8 = vpop.permute.xlu2 %2015 }
 0xaf3   : > { %3392 = vmatmul.msk.bf16.vlgmr.msra.gmra.mxu0 %vm1058_vm5, %v2016_v8 }
 0xafa   : > { %v2136_v9 = vpop.permute.xlu2 %2135 }
 0xafb   : > { %v2141_v10 = vsel %vm1058_vm5, %v2136_v9, 0 }
 0xafc   : > { %2150 = vmatpush.bf16.xpose.msrb.mxu0 %v2141_v10 }
 0xb02   : > { %v2078_v11 = vpop.permute.xlu0 %2077  ;;  %v2134_v12 = vpop.permute.xlu2 %2133 }
 0xb03   : > { %v2083_v45 = vsel %vm1058_vm5, %v2078_v11, 0  ;;  %3396 = vmatmul.msk.bf16.vlgmr.msrb.gmra.mxu0 %vm1058_vm5, %v2134_v12 }
 0xb04   : > { %2092 = vmatpush.bf16.xpose.msra.mxu2 %v2083_v45 }
 0xb08   : > { %v2076_v13 = vpop.permute.xlu1 %2075 }
 0xb0b   : > { %3394 = vmatmul.msk.bf16.vlgmr.msra.gmra.mxu2 %vm1058_vm5, %v2076_v13 }
 0xb1b   : > { %v1977_v14 = vpop.f32.mrf.mxu2 }
 0xb1c   : > { %v1981_v15 = vmul.f32 0.17677669, %v1977_v14 }
 0xb1e   : > { %v1982_v16 = vsel %vm4568_vm6, %v1981_v15, -1e+30 }
 0xb1f   : > { %v1983_v17 = vsel %vm1080_vm7, %v1982_v16, -inf }
 0xb20   : > { %1984 = vmax.xlane.f32.xlu0 %v1983_v17 }
 0xb23   : > { %v1979_v18 = vpop.f32.mrf.mxu2 }
 0xb70   : > { %v2035_v19 = vpop.f32.mrf.mxu0 }
 0xb71   : > { %v2039_v20 = vmul.f32 0.17677669, %v2035_v19 }
 0xb73   : > { %v2040_v21 = vsel %vm4568_vm6, %v2039_v20, -1e+30 }
 0xb74   : > { %v2041_v22 = vsel %vm1080_vm7, %v2040_v21, -inf }
 0xb75   : > { %2042 = vmax.xlane.f32.xlu2 %v2041_v22  ;;  %v3745_v22 = vld [vmem:[#allocation8 + $0x78] sm:$0xff] }
 0xb76   : > { %2277 = vmatpush.bf16.msrb.mxu2 %v3745_v22 }
 0xb78   : > { %v2037_v23 = vpop.f32.mrf.mxu0 }
 0xb79   : > { %v3744_v23 = vld [vmem:[#allocation8 + $0x70] sm:$0xff] }
 0xb7a   : > { %2278 = vmatpush.bf16.msrb.mxu2 %v3744_v23  ;;  %v3446_v23 = vld [vmem:[#allocation10 + $0x98] sm:$0xf0] }
 0xb80   : > { %v2152_v24 = vpop.f32.mrf.mxu0 }
 0xb81   : > { %v2156_v25 = vmul.f32 0.17677669, %v2152_v24  ;;  %v3743_v24 = vld [vmem:[#allocation8 + $0x68] sm:$0xff] }
 0xb82   : > { %2279 = vmatpush.bf16.msrb.mxu2 %v3743_v24  ;;  %v3436_v24 = vld [vmem:[#allocation10 + $0x80] sm:$0xf] }
 0xb83   : > { %v2157_v26 = vsel %vm4568_vm6, %v2156_v25, -1e+30  ;;  %v3742_v25 = vld [vmem:[#allocation8 + $0x60] sm:$0xff] }
 0xb84   : > { %v2158_v27 = vsel %vm1080_vm7, %v2157_v26, -inf }
 0xb85   : > { %2159 = vmax.xlane.f32.xlu0 %v2158_v27  ;;  %v3740_v27 = vld [vmem:[#allocation8 + $0x50] sm:$0xff] }
 0xb86   : > { %2280 = vmatpush.bf16.msrb.mxu2 %v3742_v25  ;;  %v3747_v25 = vld [vmem:[#allocation10 + $0x84] sm:$0xf0] }
 0xb88   : > { %v2154_v28 = vpop.f32.mrf.mxu0 }
 0xb89   : > { %v3739_v28 = vld [vmem:[#allocation8 + $0x48] sm:$0xff] }
 0xb8e   : > { %v2094_v29 = vpop.f32.mrf.mxu2 }
 0xb8f   : > { %v2098_v31 = vmul.f32 0.17677669, %v2094_v29  ;;  %v3738_v29 = vld [vmem:[#allocation8 + $0x40] sm:$0xff] }
 0xb91   : > { %v2099_v32 = vsel %vm4568_vm6, %v2098_v31, -1e+30 }
 0xb92   : > { %v2100_v33 = vsel %vm1080_vm7, %v2099_v32, -inf }
 0xb93   : > { %v1985_v34 = vpop.xlane.xlu0 %1984  ;;  %2101 = vmax.xlane.f32.xlu1 %v2100_v33 }
 0xb94   : > { %v1986_v36 = vsub.f32 %v1982_v16, %v1985_v34 }
 0xb96   : > { %v1987_v37 = vmul.f32 1.442695, %v1986_v36  ;;  %v2096_v38 = vpop.f32.mrf.mxu2 }
 0xb98   : > { %3962 = vpow2.f32 %v1987_v37 }
 0xb9e   : > { %v3963_v39 = vpop.eup %3962 }
 0xb9f   : > { %v1989_v40 = vsel %vm1080_vm7, %v3963_v39, 0.0 }
 0xba0   : > { %1990 = vadd.xlane.f32.xlu2 %v1989_v40 }
 0xbac   : > { %2054 = vrot.lane.b32.xlu1 %v4663_v62, %s4322_s17 }
 0xbe8   : > { %v2043_v41 = vpop.xlane.xlu2 %2042 }
 0xbe9   : > { %v2044_v42 = vsub.f32 %v2040_v21, %v2043_v41 }
 0xbeb   : > { %v2045_v43 = vmul.f32 1.442695, %v2044_v42 }
 0xbed   : > { %3964 = vpow2.f32 %v2045_v43 }
 0xbf3   : > { %v3965_v61 = vpop.eup %3964 }
 0xbf4   : > { %v2047_v44 = vsel %vm1080_vm7, %v3965_v61, 0.0 }
 0xbf5   : > { %2048 = vadd.xlane.f32.xlu0 %v2047_v44  ;;  %v3761_v44 = vld [vmem:[#allocation10 + $0xf4] sm:$0xf0] }
 0xbf8   : > { %v2160_v35 = vpop.xlane.xlu0 %2159 }
 0xbf9   : > { %v2161_v47 = vsub.f32 %v2157_v26, %v2160_v35  ;;  %v3741_v26 = vld [vmem:[#allocation8 + $0x58] sm:$0xff]  ;;  %v3760_v35 = vld [vmem:[#allocation10 + $0xf4] sm:$0xf] }
 0xbfa   : > { %2281 = vmatpush.bf16.msrb.mxu2 %v3741_v26 }
 0xbfb   : > { %v2162_v49 = vmul.f32 1.442695, %v2161_v47 }
 0xbfd   : > { %3966 = vpow2.f32 %v2162_v49  ;;  %v3494_v49 = vld [vmem:[#allocation10 + $0xf8] sm:$0xf0] }
 0xbfe   : > { %2282 = vmatpush.bf16.msrb.mxu2 %v3740_v27  ;;  %v3746_v27 = vld [vmem:[#allocation10 + $0x84] sm:$0xf] }
 0xc02   : > { %2283 = vmatpush.bf16.msrb.mxu2 %v3739_v28  ;;  %v3438_v28 = vld [vmem:[#allocation10 + $0x88] sm:$0xf0] }
 0xc03   : > { %v3967_v50 = vpop.eup %3966 }
 0xc04   : > { %v2164_v52 = vsel %vm1080_vm7, %v3967_v50, 0.0 }
 0xc05   : > { %2165 = vadd.xlane.f32.xlu0 %v2164_v52 }
 0xc06   : > { %v2102_v53 = vpop.xlane.xlu1 %2101  ;;  %2284 = vmatpush.bf16.msrb.mxu2 %v3738_v29  ;;  %v3437_v29 = vor.u32 %v3747_v25, %v3436_v24  ;;  %v3625_v25 = vld [vmem:[#allocation13 + $0x78] sm:$0xf0] }
 0xc07   : > { %v2103_v54 = vsub.f32 %v2099_v32, %v2102_v53 }
 0xc09   : > { %v2104_v55 = vmul.f32 1.442695, %v2103_v54 }
 0xc0b   : > { %3968 = vpow2.f32 %v2104_v55 }
 0xc11   : > { %v3969_v30 = vpop.eup %3968 }
 0xc12   : > { %v2106_v56 = vsel %vm1080_vm7, %v3969_v30, 0.0 }
 0xc13   : > { %v1991_v57 = vpop.xlane.xlu2 %1990  ;;  %2107 = vadd.xlane.f32.xlu2 %v2106_v56  ;;  %v3758_v56 = vld [vmem:[#allocation10 + $0xe4] sm:$0xf] }
 0xc14   : > { %3970 = vrcp.f32 %v1991_v57 }
 0xc19   : > { %2170 = vrot.lane.b32.xlu0 %v4663_v62, %s4323_s27 }
 0xc1a   : > { %v3971_v58 = vpop.eup %3970 }
 0xc1b   : > { %v1993_v59 = vmul.f32 %v3971_v58, %v3963_v39  ;;  %v3934_v39 = vld [vmem:[%s4790_s6 + $0x1] ss:$0 sm:$0xff]  ;;  %v3486_v58 = vld [vmem:[#allocation10 + $0xe8] sm:$0xf0] }
 0xc1d   : > { %v1994_v60 = vpack.c.bf16 %v1993_v59, %v1993_v59  ;;  %v3489_v59 = vor.u32 %v3758_v56, %v3486_v58 }
 0xc1e   : > { %v2055_v63 = vpop.permute.xlu1 %2054 }
 0xc1f   : > { %v2060_v48 = vsel %vm1096_vm4, %v2055_v63, 0  ;;  %3391 = vmatmul.msk.bf16.vlgmr.msrb.gmra.mxu3 %vm1080_vm7, %v1994_v60  ;;  %v3476_v60 = vld [vmem:[#allocation10 + $0xd0] sm:$0xf]  ;;  %v3757_v63 = vld [vmem:[#allocation10 + $0xd4] sm:$0xf0] }
 0xc20   : > { %2069 = vmatpush.bf16.msrb.mxu1 %v2060_v48  ;;  %v3756_v48 = vld [vmem:[#allocation10 + $0xd4] sm:$0xf] }
 0xc2b   : > { %2112 = vrot.lane.b32.xlu2 %v4663_v62, %s4324_s1 }
 0xc68   : > { %v2049_v0 = vpop.xlane.xlu0 %2048 }
 0xc69   : > { %3972 = vrcp.f32 %v2049_v0  ;;  %v3477_v0 = vor.u32 %v3757_v63, %v3476_v60  ;;  %v3771_v63 = vld [vmem:[#allocation11 + $0xc8] sm:$0xff] }
 0xc6f   : > { %v3973_v1 = vpop.eup %3972 }
 0xc70   : > { %v2051_v3 = vmul.f32 %v3973_v1, %v3965_v61  ;;  %v3492_v61 = vld [vmem:[#allocation10 + $0xf0] sm:$0xf]  ;;  %v3478_v1 = vld [vmem:[#allocation10 + $0xd8] sm:$0xf0] }
 0xc71   : > { %v3493_v47 = vor.u32 %v3761_v44, %v3492_v61 }
 0xc72   : > { %v2052_v2 = vpack.c.bf16 %v2051_v3, %v2051_v3  ;;  %v3481_v3 = vor.u32 %v3756_v48, %v3478_v1  ;;  %v3764_v48 = vld [vmem:[#allocation11 + $0x90] sm:$0xff]  ;;  %v3763_v1 = vld [vmem:[#allocation11 + $0x88] sm:$0xff] }
 0xc74   : > { %3393 = vmatmul.msk.bf16.vlgmr.msrb.gmra.mxu1 %vm1080_vm7, %v2052_v2  ;;  %v3468_v2 = vld [vmem:[#allocation10 + $0xc0] sm:$0xf] }
 0xc78   : > { %v2166_v4 = vpop.xlane.xlu0 %2165 }
 0xc79   : > { %3974 = vrcp.f32 %v2166_v4  ;;  %v3755_v4 = vld [vmem:[#allocation10 + $0xc4] sm:$0xf0] }
 0xc7f   : > { %v3975_v6 = vpop.eup %3974 }
 0xc80   : > { %v2168_v7 = vmul.f32 %v3975_v6, %v3967_v50  ;;  %v3497_v50 = vor.u32 %v3760_v35, %v3494_v49  ;;  %v3469_v6 = vor.u32 %v3755_v4, %v3468_v2  ;;  %v3773_v35 = vld [vmem:[#allocation11 + $0xd8] sm:$0xff] }
 0xc82   : > { %v2169_v11 = vpack.c.bf16 %v2168_v7, %v2168_v7  ;;  %2441 = vmatpush.bf16.msra.mxu0 %v3497_v50  ;;  %v3470_v7 = vld [vmem:[#allocation10 + $0xc8] sm:$0xf0] }
 0xc86   : > { %v2108_v5 = vpop.xlane.xlu2 %2107  ;;  %2442 = vmatpush.bf16.msra.mxu0 %v3489_v59 }
 0xc87   : > { %3976 = vrcp.f32 %v2108_v5  ;;  %v3754_v5 = vld [vmem:[#allocation10 + $0xc4] sm:$0xf] }
 0xc8a   : > { %2443 = vmatpush.bf16.msra.mxu0 %v3481_v3  ;;  %v3762_v3 = vld [vmem:[#allocation11 + $0x80] sm:$0xff] }
 0xc8b   : > { %v2171_v8 = vpop.permute.xlu0 %2170 }
 0xc8c   : > { %v2176_v9 = vsel %vm1096_vm4, %v2171_v8, 0  ;;  %v3473_v8 = vor.u32 %v3754_v5, %v3470_v7 }
 0xc8d   : > { %v3977_v10 = vpop.eup %3976  ;;  %2185 = vmatpush.bf16.msra.mxu1 %v2176_v9  ;;  %v3460_v9 = vld [vmem:[#allocation10 + $0xb0] sm:$0xf] }
 0xc8e   : > { %v2110_v62 = vmul.f32 %v3977_v10, %v3969_v30  ;;  %v2113_v12 = vpop.permute.xlu2 %2112  ;;  %v3759_v30 = vld [vmem:[#allocation10 + $0xe4] sm:$0xf0]  ;;  %2444 = vmatpush.bf16.msra.mxu0 %v3473_v8  ;;  %v3753_v10 = vld [vmem:[#allocation10 + $0xb4] sm:$0xf0] }
 0xc8f   : > { %v2118_v45 = vsel %vm1096_vm4, %v2113_v12, 0  ;;  %v3462_v12 = vld [vmem:[#allocation10 + $0xb8] sm:$0xf0] }
 0xc90   : > { %v2111_v13 = vpack.c.bf16 %v2110_v62, %v2110_v62  ;;  %2127 = vmatpush.bf16.msra.mxu3 %v2118_v45  ;;  %3397 = vmatmul.msk.bf16.vlgmr.msra.gmra.mxu1 %vm1080_vm7, %v2169_v11  ;;  %v3752_v11 = vld [vmem:[#allocation10 + $0xb4] sm:$0xf]  ;;  %v3461_v62 = vor.u32 %v3753_v10, %v3460_v9 }
 0xc91   : > { %v3465_v45 = vor.u32 %v3752_v11, %v3462_v12 }
 0xc93   : > { %3395 = vmatmul.msk.bf16.vlgmr.msra.gmra.mxu3 %vm1080_vm7, %v2111_v13  ;;  %2445 = vmatpush.bf16.msra.mxu0 %v3465_v45  ;;  %v3452_v13 = vld [vmem:[#allocation10 + $0xa0] sm:$0xf] }
 0xc94   : > { %2428 = vmatpush.bf16.msrb.mxu3 %v3493_v47  ;;  %v3765_v47 = vld [vmem:[#allocation11 + $0x98] sm:$0xff] }
 0xca2   : > { %v2010_v14 = vpop.f32.mrf.mxu3 }
 0xcaa   : > { %v2012_v15 = vpop.f32.mrf.mxu3 }
 0xcab   : > { %v3750_v15 = vld [vmem:[#allocation10 + $0xa4] sm:$0xf] }
 0xcf1   : > { %v2071_v16 = vpop.f32.mrf.mxu1 }
 0xcf2   : > { %2192 = vrot.lane.b32.xlu1 %v2071_v16, %s4323_s27 }
 0xcf9   : > { %v2073_v17 = vpop.f32.mrf.mxu1 }
 0xcfa   : > { %v3454_v17 = vld [vmem:[#allocation10 + $0xa8] sm:$0xf0] }
 0xd0d   : > { %v2187_v18 = vpop.f32.mrf.mxu1 }
 0xd0e   : > { %2200 = vrot.lane.b32.xlu0 %v2187_v18, %s4322_s17  ;;  %v3457_v18 = vor.u32 %v3750_v15, %v3454_v17  ;;  %s3794_s17 = sshll.u32 %s4437_s28, 4 }
 0xd0f   : > { %s2794_s30 = scalar_lea.hbm %s4839_s25, %s3794_s17 }
 0xd10   : > { %2446 = vmatpush.bf16.msra.mxu0 %v3457_v18  ;;  %s2798_s21 = sshll.u32 %s2794_s30, 4  ;;  %s2799_s21 = int_to_ptr.hbm [resolvable:$true] %s2798_s21 }
 0xd11   : > { %s4236_s28 = sshra.s32 %s2799_s21, 4  ;;  %s4237_s28 = int_to_ptr.hbm [resolvable:$true] %s4236_s28 }
 0xd12   : > { %s4238_s14 = scalar_lea.hbm %s4237_s28, 16  ;;  %p4243_p3 = scmp.lt.s32.totalorder %s4237_s28, %s4840_s23 }
 0xd13   : > { %p4239_p0 = scmp.ne.s32.totalorder %s4237_s28, %s4238_s14  ;;  %p4244_p4 = scmp.lt.s32.totalorder %s4242_s18, %s4238_s14 }
 0xd15   : > { %v2189_v19 = vpop.f32.mrf.mxu1  ;;  %p4240_p1 = pnand %p4239_p0, %p4454_p5  ;;  %p4245_p7 = por %p4244_p4, %p4243_p3 }
 0xd16   : > { %v2129_v20 = vpop.f32.mrf.mxu3  ;;  %v3444_v19 = vld [vmem:[#allocation10 + $0x90] sm:$0xf] }
 0xd17   : > { %2196 = vrot.lane.b32.xlu1 %v2129_v20, %s4324_s1  ;;  %v3749_v20 = vld [vmem:[#allocation10 + $0x94] sm:$0xf0]  ;;  %p4241_p2 = pneg %p4240_p1 }
 0xd18   : > { %v3445_v22 = vor.u32 %v3749_v20, %v3444_v19 }
 0xd19   : > { %p4246_p8 = pnand %p4245_p7, %p4241_p2 }
 0xd1e   : > { %v2131_v21 = vpop.f32.mrf.mxu3 }
 0xd1f   : > { %v3748_v21 = vld [vmem:[#allocation10 + $0x94] sm:$0xf] }
 0xd20   : > { %v3449_v26 = vor.u32 %v3748_v21, %v3446_v23  ;;  %v3623_v21 = vld [vmem:[#allocation13 + $0x70] sm:$0xf]  ;;  %v3792_v23 = vld [vmem:[#allocation13 + $0x74] sm:$0xf] }
 0xd22   : > { %2447 = vmatpush.bf16.msra.mxu0 %v3449_v26  ;;  %v3628_v26 = vor.u32 %v3792_v23, %v3625_v25  ;;  %v2668_v25 = vld [vmem:[#allocation14] sm:$0x3] }
 0xd64   : > { %v2193_v31 = vpop.permute.xlu1 %2192 }
 0xd65   : > { %v2203_v32 = vsel %vm1058_vm5, %v2010_v14, %v2193_v31  ;;  %v3751_v14 = vld [vmem:[#allocation10 + $0xa4] sm:$0xf0]  ;;  %v3441_v31 = vor.u32 %v3746_v27, %v3438_v28 }
 0xd66   : > { %v3453_v16 = vor.u32 %v3751_v14, %v3452_v13  ;;  %v3937_v13 = vld [vmem:[%s4796_s12 + $0x1] ss:$0 sm:$0xff] }
 0xd67   : > { %2448 = vmatpush.bf16.msra.mxu0 %v3441_v31 }
 0xd6b   : > { %2767 = vmatpush.bf16.msrb.mxu0 %v3628_v26  ;;  %v2671_v26 = vperm.slane %v2668_v25, 1 }
 0xd80   : > { %v2201_v34 = vpop.permute.xlu0 %2200 }
 0xd89   : > { %v2197_v33 = vpop.permute.xlu1 %2196 }
 0xd8a   : > { %v2204_v36 = vsel %vm1303_vm8, %v2203_v32, %v2197_v33  ;;  %v3777_v32 = vld [vmem:[#allocation11 + $0xf8] sm:$0xff] }
 0xd8b   : > { %v2205_v37 = vsel %vm1305_vm9, %v2204_v36, %v2201_v34  ;;  %v3769_v33 = vld [vmem:[#allocation11 + $0xb8] sm:$0xff]  ;;  %2605 = vmatpush.bf16.msra.mxu2 %v3777_v32  ;;  %v3615_v32 = vld [vmem:[#allocation13 + $0x60] sm:$0xf] }
 0xd8c   : > { %v2206_v38 = vpack.c.bf16 %v2205_v37, %v2205_v37  ;;  %v3776_v37 = vld [vmem:[#allocation11 + $0xf0] sm:$0xff]  ;;  %2592 = vmatpush.bf16.msrb.mxu1 %v3769_v33  ;;  %v3791_v33 = vld [vmem:[#allocation13 + $0x64] sm:$0xf0] }
 0xd8e   : > { %2285 = vmatmul.bf16.vlgmr.msrb.gmra.mxu2 %v2206_v38  ;;  %v3768_v38 = vld [vmem:[#allocation11 + $0xb0] sm:$0xff] }
 0xd8f   : > { %2606 = vmatpush.bf16.msra.mxu2 %v3776_v37  ;;  %v3617_v37 = vld [vmem:[#allocation13 + $0x68] sm:$0xf0] }
 0xd90   : > { %2593 = vmatpush.bf16.msrb.mxu1 %v3768_v38 }
 0xe11   : > { %v2286_v40 = vpop.f32.mrf.mxu2 }
 0xe12   : > { %v2287_v41 = vadd.f32 %v3934_v39, %v2286_v40  ;;  %v3775_v40 = vld [vmem:[#allocation11 + $0xe8] sm:$0xff] }
 0xe13   : > { %2607 = vmatpush.bf16.msra.mxu2 %v3775_v40  ;;  %v3789_v40 = vld [vmem:[#allocation13 + $0x54] sm:$0xf0] }
 0xe14   : > { %v2290_v42 = vadd.f32 %v2287_v41, %v4656_v51  ;;  %v3484_v51 = vld [vmem:[#allocation10 + $0xe0] sm:$0xf]  ;;  %v3767_v41 = vld [vmem:[#allocation11 + $0xa8] sm:$0xff] }
 0xe15   : > { %v3485_v57 = vor.u32 %v3759_v30, %v3484_v51  ;;  %2594 = vmatpush.bf16.msrb.mxu1 %v3767_v41  ;;  %v3935_v51 = vld [vmem:[%s4791_s7 + $0x1] ss:$0 sm:$0xff]  ;;  %v3788_v41 = vld [vmem:[#allocation13 + $0x54] sm:$0xf] }
 0xe16   : > { %2295 = vadd.xlane.f32.xlu2 %v2290_v42 }
 0xe17   : > { %2429 = vmatpush.bf16.msrb.mxu3 %v3485_v57  ;;  %v3936_v57 = vld [vmem:[%s4792_s8 + $0x1] ss:$0 sm:$0xff] }
 0xe19   : > { %v2288_v43 = vpop.f32.mrf.mxu2 }
 0xe1a   : > { %v3766_v43 = vld [vmem:[#allocation11 + $0xa0] sm:$0xff] }
 0xe1b   : > { %2430 = vmatpush.bf16.msrb.mxu3 %v3477_v0  ;;  %2595 = vmatpush.bf16.msrb.mxu1 %v3766_v43  ;;  %v3770_v0 = vld [vmem:[#allocation11 + $0xc0] sm:$0xff]  ;;  %v3609_v43 = vld [vmem:[#allocation13 + $0x58] sm:$0xf0] }
 0xe1f   : > { %2431 = vmatpush.bf16.msrb.mxu3 %v3469_v6  ;;  %2596 = vmatpush.bf16.msrb.mxu1 %v3765_v47  ;;  %v3786_v47 = vld [vmem:[#allocation13 + $0x44] sm:$0xf] }
 0xe23   : > { %2432 = vmatpush.bf16.msrb.mxu3 %v3461_v62  ;;  %2597 = vmatpush.bf16.msrb.mxu1 %v3764_v48  ;;  %v3585_v48 = vld [vmem:[#allocation13 + $0x28] sm:$0xf0] }
 0xe27   : > { %2433 = vmatpush.bf16.msrb.mxu3 %v3453_v16  ;;  %2598 = vmatpush.bf16.msrb.mxu1 %v3763_v1  ;;  %v3575_v1 = vld [vmem:[#allocation13 + $0x10] sm:$0xf] }
 0xe2b   : > { %2434 = vmatpush.bf16.msrb.mxu3 %v3445_v22  ;;  %2599 = vmatpush.bf16.msrb.mxu1 %v3762_v3  ;;  %v3793_v22 = vld [vmem:[#allocation13 + $0x74] sm:$0xf0] }
 0xe2c   : > { %v3624_v24 = vor.u32 %v3793_v22, %v3623_v21  ;;  %v3781_v3 = vld [vmem:[#allocation13 + $0x14] sm:$0xf0] }
 0xe2d   : > { %v3939_v21 = vld [vmem:[%s4837_s22 + $0x1] ss:$0 sm:$0xff] }
 0xe2f   : > { %2435 = vmatpush.bf16.msrb.mxu3 %v3437_v29 }
 0xe33   : > { %2754 = vmatpush.bf16.msra.mxu3 %v3624_v24 }
 0xe89   : > { %v2296_v52 = vpop.xlane.xlu2 %2295 }
 0xe8a   : > { %v2297_v53 = vmul.f32 %v2296_v52, %v4622_v46  ;;  %v3772_v52 = vld [vmem:[#allocation11 + $0xd0] sm:$0xff] }
 0xe8c   : > { %v4721_v54 = vsub.f32 %v2290_v42, %v2297_v53  ;;  %v3774_v42 = vld [vmem:[#allocation11 + $0xe0] sm:$0xff] }
 0xe8d   : > { %2608 = vmatpush.bf16.msra.mxu2 %v3774_v42 }
 0xe8e   : > { %v2299_v55 = vmul.f32 %v4721_v54, %v4721_v54 }
 0xe90   : > { %2300 = vadd.xlane.f32.xlu1 %v2299_v55 }
 0xe91   : > { %2609 = vmatpush.bf16.msra.mxu2 %v3773_v35  ;;  %v3787_v35 = vld [vmem:[#allocation13 + $0x44] sm:$0xf0] }
 0xe95   : > { %2610 = vmatpush.bf16.msra.mxu2 %v3772_v52 }
 0xe99   : > { %2611 = vmatpush.bf16.msra.mxu2 %v3771_v63 }
 0xe9d   : > { %2612 = vmatpush.bf16.msra.mxu2 %v3770_v0 }
 0xf03   : > { %v2301_v34 = vpop.xlane.xlu1 %2300 }
 0xf04   : > { %v2302_v36 = vmul.f32 %v2301_v34, %v4622_v46  ;;  %v3790_v34 = vld [vmem:[#allocation13 + $0x64] sm:$0xf] }
 0xf05   : > { %v3620_v38 = vor.u32 %v3790_v34, %v3617_v37 }
 0xf06   : > { %v2303_v39 = vadd.f32 1e-05, %v2302_v36  ;;  %v3616_v36 = vor.u32 %v3791_v33, %v3615_v32 }
 0xf07   : > { %2768 = vmatpush.bf16.msrb.mxu0 %v3620_v38 }
 0xf08   : > { %3978 = vrsqrt.f32 %v2303_v39  ;;  %vm2310_vm2 = vweird.f32 %v2303_v39  ;;  %2755 = vmatpush.bf16.msra.mxu3 %v3616_v36 }
 0xf0e   : > { %v3979_v61 = vpop.eup %3978 }
 0xf0f   : > { %v2305_v44 = vmul.f32 %v3979_v61, %v2303_v39  ;;  %vm2311_vm1 = vweird.f32 %v3979_v61  ;;  %v3607_v39 = vld [vmem:[#allocation13 + $0x50] sm:$0xf] }
 0xf10   : > { %vm2312_vm3 = vmor %vm2310_vm2, %vm2311_vm1  ;;  %v3608_v42 = vor.u32 %v3789_v40, %v3607_v39 }
 0xf11   : > { %v2306_v49 = vmul.f32 %v3979_v61, %v2305_v44  ;;  %v3599_v44 = vld [vmem:[#allocation13 + $0x40] sm:$0xf] }
 0xf12   : > { %2756 = vmatpush.bf16.msra.mxu3 %v3608_v42 }
 0xf13   : > { %v2307_v50 = vmul.f32 0.5, %v2306_v49  ;;  %v3600_v49 = vor.u32 %v3787_v35, %v3599_v44 }
 0xf15   : > { %v2308_v53 = vsub.f32 1.5, %v2307_v50  ;;  %v3601_v50 = vld [vmem:[#allocation13 + $0x48] sm:$0xf0] }
 0xf16   : > { %v3604_v52 = vor.u32 %v3786_v47, %v3601_v50  ;;  %2757 = vmatpush.bf16.msra.mxu3 %v3600_v49 }
 0xf17   : > { %v2309_v55 = vmul.f32 %v3979_v61, %v2308_v53  ;;  %v3591_v53 = vld [vmem:[#allocation13 + $0x30] sm:$0xf] }
 0xf19   : > { %v2313_v30 = vsel %vm2312_vm3, %v3979_v61, %v2309_v55  ;;  %v3612_v61 = vor.u32 %v3788_v41, %v3609_v43  ;;  %v3785_v55 = vld [vmem:[#allocation13 + $0x34] sm:$0xf0] }
 0xf1a   : > { %v2314_v56 = vmul.f32 %v2313_v30, %v4721_v54  ;;  %v3433_v54 = vld [vmem:[%s4794_s10 + $0x2] sm:$0x3]  ;;  %v3592_v30 = vor.u32 %v3785_v55, %v3591_v53 }
 0xf1b   : > { %v2345_v2 = vperm.slane %v3433_v54, 1  ;;  %v2344_v7 = vperm.slane %v3433_v54, 0  ;;  %2769 = vmatpush.bf16.msrb.mxu0 %v3612_v61  ;;  %v3780_v54 = vld [vmem:[#allocation13 + $0x14] sm:$0xf] }
 0xf1c   : > { %v2318_v58 = vmul.f32 %v3935_v51, %v2314_v56  ;;  %v3784_v51 = vld [vmem:[#allocation13 + $0x34] sm:$0xf]  ;;  %v3593_v56 = vld [vmem:[#allocation13 + $0x38] sm:$0xf0]  ;;  %2758 = vmatpush.bf16.msra.mxu3 %v3592_v30 }
 0xf1e   : > { %v2322_v59 = vadd.f32 %v3936_v57, %v2318_v58  ;;  %v3596_v57 = vor.u32 %v3784_v51, %v3593_v56  ;;  %v3583_v58 = vld [vmem:[#allocation13 + $0x20] sm:$0xf] }
 0xf1f   : > { %2770 = vmatpush.bf16.msrb.mxu0 %v3604_v52 }
 0xf20   : > { %v2323_v60 = vpack.c.bf16 %v2322_v59, %v2322_v59 }
 0xf22   : > { %2436 = vmatmul.bf16.vlgmr.msrb.gmra.mxu3 %v2323_v60  ;;  %2449 = vmatmul.bf16.vlgmr.msra.gmra.mxu0 %v2323_v60  ;;  %v3782_v60 = vld [vmem:[#allocation13 + $0x24] sm:$0xf] }
 0xf23   : > { %2771 = vmatpush.bf16.msrb.mxu0 %v3596_v57  ;;  %v3588_v0 = vor.u32 %v3782_v60, %v3585_v48 }
 0xf27   : > { %2772 = vmatpush.bf16.msrb.mxu0 %v3588_v0 }
 0xf9f   : > { %v2450_v4 = vpop.f32.mrf.mxu0 }
 0xfa0   : > { %v2451_v5 = vadd.f32 %v2450_v4, %v2345_v2  ;;  %v3576_v2 = vor.u32 %v3781_v3, %v3575_v1  ;;  %v3577_v4 = vld [vmem:[#allocation13 + $0x18] sm:$0xf0] }
 0xfa2   : > { %v2455_v6 = vmax.f32 %v2451_v5, 0.0  ;;  %v3567_v5 = vld [vmem:[#allocation13] sm:$0xf] }
 0xfa4   : > { %v2457_v8 = vpack.c.bf16 %v2455_v6, %v2455_v6  ;;  %v3779_v6 = vld [vmem:[#allocation13 + $0x4] sm:$0xf0] }
 0xfa5   : > { %v2437_v9 = vpop.f32.mrf.mxu3 }
 0xfa6   : > { %v2438_v10 = vadd.f32 %v2437_v9, %v2344_v7  ;;  %2613 = vmatmul.bf16.vlgmr.msra.gmra.mxu2 %v2457_v8  ;;  %v3580_v7 = vor.u32 %v3780_v54, %v3577_v4  ;;  %v3778_v8 = vld [vmem:[#allocation13 + $0x4] sm:$0xf]  ;;  %v3569_v9 = vld [vmem:[#allocation13 + $0x8] sm:$0xf0] }
 0xfa7   : > { %v2452_v11 = vpop.f32.mrf.mxu0 }
 0xfa8   : > { %v2454_v62 = vmax.f32 %v2438_v10, 0.0  ;;  %v3568_v10 = vor.u32 %v3779_v6, %v3567_v5  ;;  %2773 = vmatpush.bf16.msrb.mxu0 %v3580_v7  ;;  %v3572_v11 = vor.u32 %v3778_v8, %v3569_v9 }
 0xfaa   : > { %v2456_v12 = vpack.c.bf16 %v2454_v62, %v2454_v62 }
 0xfac   : > { %2600 = vmatmul.bf16.vlgmr.msrb.gmra.mxu1 %v2456_v12  ;;  %2774 = vmatpush.bf16.msrb.mxu0 %v3572_v11 }
 0xfad   : > { %v2439_v45 = vpop.f32.mrf.mxu3 }
0x1029   : > { %v2601_v14 = vpop.f32.mrf.mxu1  ;;  %v2614_v15 = vpop.f32.mrf.mxu2 }
0x102a   : > { %v2602_v16 = vadd.f32 %v3937_v13, %v2601_v14 }
0x102c   : > { %v2615_v17 = vadd.f32 %v2614_v15, %v2602_v16 }
0x102e   : > { %v2618_v18 = vadd.f32 %v2615_v17, %v2322_v59  ;;  %v3783_v59 = vld [vmem:[#allocation13 + $0x24] sm:$0xf0] }
0x102f   : > { %v3584_v63 = vor.u32 %v3783_v59, %v3583_v58 }
0x1030   : > { %2623 = vadd.xlane.f32.xlu0 %v2618_v18 }
0x1031   : > { %v2603_v19 = vpop.f32.mrf.mxu1  ;;  %v2616_v20 = vpop.f32.mrf.mxu2  ;;  %2759 = vmatpush.bf16.msra.mxu3 %v3584_v63 }
0x1032   : > { %v3938_v19 = vld [vmem:[%s4797_s13 + $0x1] ss:$0 sm:$0xff] }
0x1035   : > { %2760 = vmatpush.bf16.msra.mxu3 %v3576_v2 }
0x1039   : > { %2761 = vmatpush.bf16.msra.mxu3 %v3568_v10 }
0x10a3   : > { %v2624_v27 = vpop.xlane.xlu0 %2623 }
0x10a4   : > { %v2625_v28 = vmul.f32 %v2624_v27, %v4622_v46 }
0x10a6   : > { %v4740_v29 = vsub.f32 %v2618_v18, %v2625_v28 }
0x10a8   : > { %v2627_v31 = vmul.f32 %v4740_v29, %v4740_v29 }
0x10aa   : > { %2628 = vadd.xlane.f32.xlu2 %v2627_v31 }
0x111d   : > { %v2629_v62 = vpop.xlane.xlu2 %2628 }
0x111e   : > { %v2630_v12 = vmul.f32 %v2629_v62, %v4622_v46 }
0x1120   : > { %v2631_v45 = vadd.f32 1e-05, %v2630_v12 }
0x1122   : > { %3980 = vrsqrt.f32 %v2631_v45  ;;  %vm2638_vm5 = vweird.f32 %v2631_v45 }
0x1128   : > { %v3981_v13 = vpop.eup %3980 }
0x1129   : > { %v2633_v14 = vmul.f32 %v3981_v13, %v2631_v45  ;;  %vm2639_vm4 = vweird.f32 %v3981_v13 }
0x112a   : > { %vm2640_vm6 = vmor %vm2638_vm5, %vm2639_vm4 }
0x112b   : > { %v2634_v15 = vmul.f32 %v3981_v13, %v2633_v14 }
0x112d   : > { %v2635_v16 = vmul.f32 0.5, %v2634_v15 }
0x112f   : > { %v2636_v17 = vsub.f32 1.5, %v2635_v16 }
0x1131   : > { %v2637_v18 = vmul.f32 %v3981_v13, %v2636_v17 }
0x1133   : > { %v2641_v20 = vsel %vm2640_vm6, %v3981_v13, %v2637_v18 }
0x1134   : > { %v2642_v46 = vmul.f32 %v2641_v20, %v4740_v29  ;;  %v2670_v29 = vperm.slane %v2668_v25, 0 }
0x1136   : > { %v2646_v22 = vmul.f32 %v3938_v19, %v2642_v46 }
0x1138   : > { %v2650_v23 = vadd.f32 %v3939_v21, %v2646_v22 }
0x113a   : > { %v2651_v24 = vpack.c.bf16 %v2650_v23, %v2650_v23 }
0x113c   : > { %2762 = vmatmul.bf16.vlgmr.msra.gmra.mxu3 %v2651_v24  ;;  %2775 = vmatmul.bf16.vlgmr.msrb.gmra.mxu0 %v2651_v24 }
0x11b9   : > { %v2776_v27 = vpop.f32.mrf.mxu0 }
0x11ba   : > { %v2777_v28 = vadd.f32 %v2776_v27, %v2671_v26 }
0x11bc   : > { %2781 = vst [vmem:[%s668_s5 + $0x8] sm:$0xff] %v2777_v28 }
0x11bf   : > { %v2763_v31 = vpop.f32.mrf.mxu3 }
0x11c0   : > { %v2764_v32 = vadd.f32 %v2763_v31, %v2670_v29 }
0x11c1   : > { %v2778_v33 = vpop.f32.mrf.mxu0 }
0x11c2   : > { %2780 = vst [vmem:[%s668_s5] sm:$0xff] %v2764_v32 }
0x11c3   : > { %4249 = shalt.err (!%p4246_p8)
}
0x11c4   : > { %3827 = dma.vmem_to_hbm [thread:$0]  (%p4454_p5), %s2797_s19, 256, %s2799_s21, %s2783_s26  }
0x11c7   : > { %v2765_v34 = vpop.f32.mrf.mxu3 }
0x11c8 PF: > { %s4842_s29 = sld [smem:[#allocation26_spill]] }
0x11c9   : > { %s4843_s27 = sld [smem:[#allocation23_spill]] }
0x11ce   : > { %p3874_p9 = scmp.ge.s32.totalorder %s4842_s29, 2 }
0x11cf   : > { %s2810_s25 = sand.u32 1, %s4843_s27  }
0x11d0   : > { %p3855_p10 = pnand %p3874_p9, %p4458_p6  ;;  %s2811_s30 = scalar_lea.sflag [#allocation4], %s2810_s25 }
0x11d2   : > { %p3856_p11 = pneg %p3855_p10 }
0x11d4   : > { %4287 = dma.done.wait (%p3856_p11), %s2811_s30, 256  }
0x11d5   : > { %4289 = vsyncadd (%p3856_p11), %s2811_s30, 4294967040  ;;  %s4845_s27 = sld [smem:[#allocation27_spill]] }
0x11d6   : > { %s4846_s24 = sld [smem:[#allocation24_spill]] }
0x11d7   : > { %s4847_s25 = sld [smem:[#allocation25_spill]] }
0x11d8   : > { %s4848_s26 = sld [smem:[#allocation28_spill]] }
0x11db   : > { %p32_p12 = scmp.ge.s32.totalorder %s4845_s27, 4  }
0x11dd   :  { %34 = sbr.rel (!%p32_p12) target bundleno = 15 (0xf), region = 168 }
0x11e2   :  { %2817 = vsyncpa [#allocation3], 1 }
0x11e3   :  { %2819 = vsyncpa [#allocation3 + $0x1], 1 }
0x11e4   :  { %2820 = vsyncpa [#allocation6], 1 }
0x11e5   :  { %2821 = vsyncpa [#allocation9], 1 }
0x11e6   :  { %2822 = vsyncpa [#allocation12], 1 }
0x11e7   :  { %2823 = vsyncpa [#allocation15], 1 }
0x11e8   :  { %2824 = vsyncpa [#allocation4], 1 }
0x11e9   :  { %2826 = vsyncpa [#allocation4 + $0x1], 1 }

</bundles_post_ra>
